<compile_context>
chip_gen: v6e
topology: v6e:2x2x1
jax: 0.10.0
libtpu: 0.0.40
codegen_flags: <defaults>
</compile_context>

<pallas_src>
import jax
import jax.numpy as jnp
from jax.experimental import pallas as pl
from jax.experimental.pallas import tpu as pltpu


def _upsample_kernel(x_ref, w_ref, b_ref, o_ref):
    # x_ref: (1, TH, W, Cin)        input tile, NHWC
    # w_ref: (Cin, Cout)            1x1 conv weight with BN scale folded in
    # b_ref: (1, Cout)              folded BN bias
    # o_ref: (1, 2*TH, 2*W, Cout)   2x nearest-upsampled output tile, NHWC
    x = x_ref[0]                                    # (TH, W, Cin)
    th, w, cin = x.shape
    xm = x.reshape(th * w, cin)

    # 1x1 convolution == per-pixel channel matmul (MXU), f32 accumulation,
    # full-precision passes to match the fp32 PyTorch conv.
    y = jnp.dot(xm, w_ref[...],
                preferred_element_type=jnp.float32,
                precision=jax.lax.Precision.HIGHEST)        # (TH*W, Cout)

    # Folded BatchNorm bias (scale already folded into the weight) + LeakyReLU.
    y = y + b_ref[...]
    y = jnp.where(y >= 0, y, 0.1 * y)

    # Nearest-neighbor 2x upsample, fully in-kernel (sublane/leading repeats).
    y = y.reshape(th, w, -1)                        # (TH, W, Cout)
    y = jnp.repeat(y, 2, axis=1)                    # (TH, 2W, Cout)  width
    y = jnp.repeat(y, 2, axis=0)                    # (2TH, 2W, Cout) height

    o_ref[0] = y.astype(o_ref.dtype)


def _choose_th(H, W, Cin, Cout, budget_bytes=8 << 20):
    """Largest H-tile (divisor of H) whose double-buffered blocks fit budget.

    Prefers TH < H so the grid has several steps (pipelining + megacore)."""
    divisors = [d for d in range(1, H + 1) if H % d == 0]

    def block_bytes(th):
        in_b = th * W * Cin * 4
        out_b = 4 * th * W * Cout * 4
        return 2 * (in_b + out_b)   # double-buffered input + output blocks

    fitting = [d for d in divisors if block_bytes(d) <= budget_bytes]
    if not fitting:
        return 1
    preferred = [d for d in fitting if d < H] or fitting
    return max(preferred)


def upsample_forward(x_nchw, conv_w, bn_gamma, bn_beta, bn_mean, bn_var,
                     eps=1e-5):
    """Forward pass of the Upsample module (eval-mode BatchNorm).

    x_nchw: (N, Cin, H, W) float32
    conv_w: (Cout, Cin, 1, 1) float32   1x1 conv weight (PyTorch layout)
    bn_*:   (Cout,) BatchNorm2d parameters / running stats
    returns (N, Cout, 2H, 2W) float32   (NCHW, like the PyTorch module)
    """
    N, Cin, H, W = x_nchw.shape
    Cout = conv_w.shape[0]

    # Fold BN (inference) into the conv: y = (x @ w) * scale + bias
    #                                      = x @ (w * scale) + bias
    scale = bn_gamma / jnp.sqrt(bn_var + eps)                     # (Cout,)
    bias = bn_beta - bn_mean * scale                              # (Cout,)
    w = jnp.transpose(conv_w[:, :, 0, 0], (1, 0)) * scale[None, :]  # (Cin, Cout)

    x = jnp.transpose(x_nchw, (0, 2, 3, 1)).astype(jnp.float32)   # NHWC

    TH = _choose_th(H, W, Cin, Cout)
    grid = (N, H // TH)

    out_nhwc = pl.pallas_call(
        _upsample_kernel,
        out_shape=jax.ShapeDtypeStruct((N, 2 * H, 2 * W, Cout), jnp.float32),
        grid_spec=pltpu.PrefetchScalarGridSpec(
            num_scalar_prefetch=0,
            grid=grid,
            in_specs=[
                pl.BlockSpec((1, TH, W, Cin), lambda n, h: (n, h, 0, 0)),
                pl.BlockSpec((Cin, Cout), lambda n, h: (0, 0)),
                pl.BlockSpec((1, Cout), lambda n, h: (0, 0)),
            ],
            out_specs=pl.BlockSpec((1, 2 * TH, 2 * W, Cout),
                                   lambda n, h: (n, h, 0, 0)),
        ),
        compiler_params=pltpu.CompilerParams(
            dimension_semantics=("parallel", "parallel")),
    )(x, w.astype(jnp.float32), bias.reshape(1, Cout).astype(jnp.float32))

    # Single remaining layout pass: NHWC -> NCHW to match the PyTorch module.
    return jnp.transpose(out_nhwc, (0, 3, 1, 2))


def _reference(x_nchw, conv_w, bn_gamma, bn_beta, bn_mean, bn_var, eps=1e-5):
    scale = bn_gamma / jnp.sqrt(bn_var + eps)
    bias = bn_beta - bn_mean * scale
    x = jnp.transpose(x_nchw, (0, 2, 3, 1))
    w = jnp.transpose(conv_w[:, :, 0, 0], (1, 0))
    y = jnp.einsum('nhwc,cd->nhwd', x, w,
                   precision=jax.lax.Precision.HIGHEST)
    y = y * scale + bias
    y = jnp.where(y >= 0, y, 0.1 * y)
    y = jnp.repeat(jnp.repeat(y, 2, axis=1), 2, axis=2)
    return jnp.transpose(y, (0, 3, 1, 2))


if __name__ == "__main__":
    N, Cin, Cout, H, W = 2, 4, 8, 16, 16

    key = jax.random.PRNGKey(0)
    kx, kw = jax.random.split(key)
    x = jax.random.normal(kx, (N, Cin, H, W), dtype=jnp.float32)

    # Conv2d(in=Cin, out=Cout, k=1, bias=False) weight: (Cout, Cin, 1, 1)
    conv_w = jax.random.normal(kw, (Cout, Cin, 1, 1), dtype=jnp.float32) * 0.1

    # BatchNorm2d(Cout) parameters (eval-mode semantics).
    eps = 1e-5
    gamma = 1.0 + 0.1 * jnp.arange(Cout, dtype=jnp.float32)
    beta = 0.05 * jnp.arange(Cout, dtype=jnp.float32)
    running_mean = 0.02 * jnp.arange(Cout, dtype=jnp.float32)
    running_var = 1.0 + 0.03 * jnp.arange(Cout, dtype=jnp.float32)

    out = upsample_forward(x, conv_w, gamma, beta, running_mean, running_var,
                           eps)
    out = jax.block_until_ready(out)

    ref = _reference(x, conv_w, gamma, beta, running_mean, running_var, eps)
    assert out.shape == (N, Cout, 2 * H, 2 * W), out.shape
    assert jnp.allclose(out, ref, atol=1e-5, rtol=1e-5), \
        float(jnp.max(jnp.abs(out - ref)))

    print("KERNEL_OK")
</pallas_src>

<mosaic_0001>
module attributes {stable_mosaic.version = 11 : i64} {
  func.func @_upsample_kernel(%arg0: i32, %arg1: i32, %arg2: memref<1x8x16x4xf32, #tpu.memory_space<vmem>>, %arg3: memref<4x8xf32, #tpu.memory_space<vmem>>, %arg4: memref<1x8xf32, #tpu.memory_space<vmem>>, %arg5: memref<1x16x32x8xf32, #tpu.memory_space<vmem>>) attributes {dimension_semantics = [#tpu.dimension_semantics<parallel>, #tpu.dimension_semantics<parallel>], iteration_bounds = array<i64: 2, 2>, scalar_prefetch = 0 : i64, scratch_operands = 0 : i64, tpu.core_type = #tpu.core_type<tc>, window_params = [{transform_indices = @transform_0, window_bounds = array<i64: 1, 8, 16, 4>}, {pipeline_mode = #tpu.pipeline_mode<synchronous>, transform_indices = @transform_1, window_bounds = array<i64: 4, 8>}, {pipeline_mode = #tpu.pipeline_mode<synchronous>, transform_indices = @transform_2, window_bounds = array<i64: 1, 8>}, {transform_indices = @transform_3, window_bounds = array<i64: 1, 16, 32, 8>}]} {
    %c0 = arith.constant 0 : index
    %c0_0 = arith.constant 0 : index
    %c0_1 = arith.constant 0 : index
    %c0_2 = arith.constant 0 : index
    %0 = vector.load %arg2[%c0, %c0_0, %c0_1, %c0_2] : memref<1x8x16x4xf32, #tpu.memory_space<vmem>>, vector<1x8x16x4xf32>
    %1 = vector.shape_cast %0 : vector<1x8x16x4xf32> to vector<8x16x4xf32>
    %2 = vector.shape_cast %1 : vector<8x16x4xf32> to vector<128x4xf32>
    %c0_3 = arith.constant 0 : index
    %c0_4 = arith.constant 0 : index
    %3 = vector.load %arg3[%c0_3, %c0_4] : memref<4x8xf32, #tpu.memory_space<vmem>>, vector<4x8xf32>
    %cst = arith.constant dense<0.000000e+00> : vector<128x8xf32>
    %4 = tpu.matmul %2, %3, %cst {dimension_numbers = #tpu.dot_dimension_numbers<[1], [0], [0], [1], [0, 0, 1, 1], [], []>, precision = #tpu.contract_precision<fp32>} : vector<128x4xf32>, vector<4x8xf32>, vector<128x8xf32> -> vector<128x8xf32>
    %c0_5 = arith.constant 0 : index
    %c0_6 = arith.constant 0 : index
    %5 = vector.load %arg4[%c0_5, %c0_6] : memref<1x8xf32, #tpu.memory_space<vmem>>, vector<1x8xf32>
    %6 = vector.broadcast %5 : vector<1x8xf32> to vector<128x8xf32>
    %7 = arith.addf %4, %6 : vector<128x8xf32>
    %cst_7 = arith.constant 0.000000e+00 : f32
    %8 = vector.broadcast %cst_7 : f32 to vector<128x8xf32>
    %9 = arith.cmpf oge, %7, %8 : vector<128x8xf32>
    %cst_8 = arith.constant 1.000000e-01 : f32
    %10 = vector.broadcast %cst_8 : f32 to vector<128x8xf32>
    %11 = arith.mulf %10, %7 : vector<128x8xf32>
    %12 = arith.select %9, %7, %11 : vector<128x8xi1>, vector<128x8xf32>
    %13 = vector.shape_cast %12 : vector<128x8xf32> to vector<8x16x8xf32>
    %14 = vector.shape_cast %13 : vector<8x16x8xf32> to vector<8x16x1x8xf32>
    %15 = vector.broadcast %14 : vector<8x16x1x8xf32> to vector<8x16x2x8xf32>
    %16 = vector.shape_cast %15 : vector<8x16x2x8xf32> to vector<8x32x8xf32>
    %17 = vector.shape_cast %16 : vector<8x32x8xf32> to vector<8x1x32x8xf32>
    %18 = vector.broadcast %17 : vector<8x1x32x8xf32> to vector<8x2x32x8xf32>
    %19 = vector.shape_cast %18 : vector<8x2x32x8xf32> to vector<16x32x8xf32>
    %c0_9 = arith.constant 0 : index
    %c0_10 = arith.constant 0 : index
    %c0_11 = arith.constant 0 : index
    %c0_12 = arith.constant 0 : index
    %20 = vector.load %arg5[%c0_9, %c0_10, %c0_11, %c0_12] : memref<1x16x32x8xf32, #tpu.memory_space<vmem>>, vector<1x16x32x8xf32>
    %21 = vector.shape_cast %20 : vector<1x16x32x8xf32> to vector<16x32x8xf32>
    %22 = vector.shape_cast %19 : vector<16x32x8xf32> to vector<1x16x32x8xf32>
    tpu.vector_store %arg5[%c0_9, %c0_10, %c0_11, %c0_12], %22 {strides = array<i32>} : memref<1x16x32x8xf32, #tpu.memory_space<vmem>>, vector<1x16x32x8xf32>,
    return
  }
  func.func @transform_0(%arg0: i32, %arg1: i32) -> (i32, i32, i32, i32) {
    %c0_i32 = arith.constant 0 : i32
    %c0_i32_0 = arith.constant 0 : i32
    %c0_i32_1 = arith.constant 0 : i32
    return %arg0, %arg1, %c0_i32, %c0_i32_0 : i32, i32, i32, i32
  }
  func.func @transform_1(%arg0: i32, %arg1: i32) -> (i32, i32) {
    %c0_i32 = arith.constant 0 : i32
    %c0_i32_0 = arith.constant 0 : i32
    %c0_i32_1 = arith.constant 0 : i32
    return %c0_i32, %c0_i32_0 : i32, i32
  }
  func.func @transform_2(%arg0: i32, %arg1: i32) -> (i32, i32) {
    %c0_i32 = arith.constant 0 : i32
    %c0_i32_0 = arith.constant 0 : i32
    %c0_i32_1 = arith.constant 0 : i32
    return %c0_i32, %c0_i32_0 : i32, i32
  }
  func.func @transform_3(%arg0: i32, %arg1: i32) -> (i32, i32, i32, i32) {
    %c0_i32 = arith.constant 0 : i32
    %c0_i32_0 = arith.constant 0 : i32
    %c0_i32_1 = arith.constant 0 : i32
    return %arg0, %arg1, %c0_i32, %c0_i32_0 : i32, i32, i32, i32
  }
}

</mosaic_0001>

<bundles_post_ra>
// kernel: tpu_custom_call.1
= control target key start
LH: loop header
LB: loop body
LE: loop exit
PB: predicated region body
PF: predicated region fallthrough
CT: control target
= control target key end

     0   :  { %s3861_s12 = smov 0   ;;  %s3863_s13 = smov 0   ;;  %s4790_s0 = inlined_call_operand.vmem [shape: f32[2,16,16,4], index: 0, kind: input, shape index: {}]   ;;  %s4791_s1 = inlined_call_operand.vmem [shape: f32[4,8], index: 1, kind: input, shape index: {}]   ;;  %s4792_s2 = inlined_call_operand.vmem [shape: f32[1,8], index: 2, kind: input, shape index: {}]   ;;  %s4793_s3 = inlined_call_operand.vmem [shape: f32[2,32,32,8], index: 3, kind: output, shape index: {}]  }
   0x1   :  { %s3865_s14 = smov 0   ;;  %s3867_s15 = smov 0  }
   0x2   :  { %s3869_s16 = smov 0  }
   0x3 LB: > { %s22_s17 = sadd.s32 1, %s3829_s14  ;;  %s25_s18 = sadd.s32 1, %s3833_s15  ;;  %s3837_s16 = sphi %s3869_s16, %s13_s16   ;;  %s3833_s15 = sphi %s3867_s15, %s4798_s15   ;;  %s3829_s14 = sphi %s3865_s14, %s4797_s14   ;;  %s3825_s13 = sphi %s3863_s13, %s4796_s13   ;;  %s3821_s12 = sphi %s3861_s12, %s4795_s12  }
   0x4   : > { %p23_p0 = scmp.ge.s32.totalorder %s22_s17, 2  ;;  %p3487_p1 = scmp.ge.s32.totalorder %s3837_s16, 1 }
   0x5   : > { %p159_p2 = scmp.lt.s32.totalorder %s3837_s16, 5 }
   0x6   : > { %s4800_s17 = smov (%p23_p0, %s22_s17), 0  ;;  %s4802_s18 = smov (!%p23_p0, %s25_s18), %s3833_s15 }
   0x7   : > { %p160_p3 = pnand %p3487_p1, %p159_p2  ;;  %p27_p4 = scmp.ge.s32.totalorder %s4802_s18, 2 }
   0x8   : > { %s3488_s21 = sshll.u32 (!%p160_p3), %s3821_s12, 3  ;;  %p194_p5 = scmp.lt.s32.totalorder (!%p160_p3), %s3825_s13, 1 }
   0x9   : > { %s4804_s18 = smov (%p27_p4, %s4802_s18), 0  ;;  %163 = sbr.rel (%p160_p3) target bundleno = 451 (0x1c3), region = 32 }
   0xa   : > { %p196_p6 = scmp.lt.s32.totalorder (!%p160_p3), %s3488_s21, 15  ;;  %s3492_s4 = sshll.u32 (!%p160_p3), %s3821_s12, 4 }
   0xb   : > { %p4257_p7 = scmp.lt.s32.totalorder (!%p160_p3), %s3492_s4, 31 }
   0xe   : > { %v231_v0 = vld [vmem:[%s4791_s1] sm:$0xf]  ;;  %vm288_vm0 = vcmask 1043456   ;;  %s4806_s13 = smov (!%p194_p5, %s3825_s13), 1  ;;  %s4808_s21 = smov (!%p196_p6, %s3488_s21), 15  ;;  %vm239_vm1 = vcmask 31744  }
   0xf   : > { %v290_v1 = vsel %vm288_vm0, %v231_v0, 0  ;;  %s3490_s22 = sshll.u32 %s4806_s13, 5  ;;  %s3489_s23 = sshll.u32 %s4808_s21, 1  ;;  %vm3319_vm5 = vcmask 64512  }
  0x10   : > { %v3897_v2 = vand.u32 4294901760, %v290_v1  ;;  %s200_s24 = sadd.s32 %s3490_s22, %s3489_s23  ;;  %s4810_s4 = smov (!%p4257_p7, %s3492_s4), 31 }
  0x11   : > { %s3491_s25 = sshll.u32 %s200_s24, 3  ;;  %s3493_s6 = sshll.u32 %s4810_s4, 2 }
  0x12   : > { %3601 = vmatprep.subr.mxu0 %v3897_v2  ;;  %v3903_v3 = vsub.f32 %v290_v1, %v3897_v2  ;;  %s3916_s28 = scalar_lea.vmem %s4790_s0, %s3491_s25  ;;  %s3494_s7 = sshll.u32 %s4806_s13, 7 }
  0x13   : > { %3602 = vmatpush3.msra.mxu0 %v3897_v2  ;;  %v215_v6 = vld [vmem:[%s3916_s28] sm:$0xff]  ;;  %v216_v7 = vld [vmem:[%s3916_s28 + $0x8] sm:$0xff]  ;;  %v217_v8 = vld [vmem:[%s3916_s28 + $0x10] sm:$0xff]  ;;  %s211_s8 = sadd.s32 %s3494_s7, %s3493_s6 }
  0x14   : > { %v3908_v4 = vand.u32 4294901760, %v3903_v3  ;;  %3653 = vmatprep.subr.mxu0 %v3903_v3  ;;  %v241_v10 = vsel %vm239_vm1, %v215_v6, 0  ;;  %v244_v11 = vsel %vm239_vm1, %v216_v7, 0  ;;  %v247_v12 = vsel %vm239_vm1, %v217_v8, 0  ;;  %v218_v13 = vld [vmem:[%s3916_s28 + $0x18] sm:$0xff]  ;;  %v219_v14 = vld [vmem:[%s3916_s28 + $0x20] sm:$0xff] }
  0x15   : > { %v3926_v15 = vand.u32 4294901760, %v241_v10  ;;  %v3928_v16 = vand.u32 4294901760, %v244_v11  ;;  %v3930_v17 = vand.u32 4294901760, %v247_v12  ;;  %v250_v18 = vsel %vm239_vm1, %v218_v13, 0  ;;  %v220_v19 = vld [vmem:[%s3916_s28 + $0x28] sm:$0xff]  ;;  %v221_v23 = vld [vmem:[%s3916_s28 + $0x30] sm:$0xff] }
  0x16   : > { %v552_v5 = vsub.f32 %v3903_v3, %v3908_v4  ;;  %v3934_v20 = vand.u32 4294901760, %v250_v18  ;;  %v253_v21 = vsel %vm239_vm1, %v219_v14, 0  ;;  %v256_v22 = vsel %vm239_vm1, %v220_v19, 0  ;;  %v222_v24 = vld [vmem:[%s3916_s28 + $0x38] sm:$0xff]  ;;  %v223_v49 = vld [vmem:[%s3916_s28 + $0x40] sm:$0xff]  ;;  %v224_v50 = vld [vmem:[%s3916_s28 + $0x48] sm:$0xff] }
  0x17   : > { %v3941_v25 = vsub.f32 %v241_v10, %v3926_v15  ;;  %3629 = vmatprep.mubr.f32.mxu1 %v3926_v15  ;;  %v3945_v26 = vsub.f32 %v244_v11, %v3928_v16  ;;  %v3948_v27 = vsub.f32 %v247_v12, %v3930_v17  ;;  %v3950_v28 = vand.u32 4294901760, %v253_v21  ;;  %v225_v51 = vld [vmem:[%s3916_s28 + $0x50] sm:$0xff]  ;;  %v226_v59 = vld [vmem:[%s3916_s28 + $0x58] sm:$0xff]  ;;  %v227_v60 = vld [vmem:[%s3916_s28 + $0x60] sm:$0xff]  ;;  %s3495_s9 = sshll.u32 %s211_s8, 3 }
  0x18   : > { %v553_v9 = vand.u32 4294901760, %v552_v5  ;;  %v3955_v29 = vsub.f32 %v250_v18, %v3934_v20  ;;  %v3957_v30 = vand.u32 4294901760, %v256_v22  ;;  %v259_v31 = vsel %vm239_vm1, %v221_v23, 0  ;;  %v228_v8 = vld [vmem:[%s3916_s28 + $0x68] sm:$0xff]  ;;  %v229_v13 = vld [vmem:[%s3916_s28 + $0x70] sm:$0xff]  ;;  %s4313_s12 = scalar_lea.vmem %s4793_s3, %s3495_s9 }
  0x19   : > { %v262_v32 = vsel %vm239_vm1, %v222_v24, 0  ;;  %v360_v33 = vand.u32 4294901760, %v3941_v25  ;;  %v370_v34 = vand.u32 4294901760, %v3945_v26  ;;  %v380_v35 = vand.u32 4294901760, %v3948_v27 }
  0x1a   : > { %3627 = vmatprep.subr.mxu1 %v553_v9  ;;  %v3967_v36 = vsub.f32 %v253_v21, %v3950_v28  ;;  %v390_v37 = vand.u32 4294901760, %v3955_v29  ;;  %v3971_v38 = vsub.f32 %v256_v22, %v3957_v30  ;;  %v3973_v39 = vand.u32 4294901760, %v259_v31 }
  0x1b   : > { %3628 = vmatpush3.msra.mxu1 %v553_v9  ;;  %v3975_v40 = vand.u32 4294901760, %v262_v32  ;;  %v361_v41 = vsub.f32 %v3941_v25, %v360_v33  ;;  %v371_v42 = vsub.f32 %v3945_v26, %v370_v34  ;;  %v381_v43 = vsub.f32 %v3948_v27, %v380_v35 }
  0x1c   : > { %3630 = vmatmul.mubr.f32.vlgmr.msra.gmra.mxu1 %v3928_v16  ;;  %3679 = vmatprep.subr.mxu1 %v3897_v2  ;;  %v400_v44 = vand.u32 4294901760, %v3967_v36  ;;  %v391_v45 = vsub.f32 %v3955_v29, %v390_v37  ;;  %v410_v46 = vand.u32 4294901760, %v3971_v38  ;;  %v3994_v47 = vsub.f32 %v259_v31, %v3973_v39  ;;  %v230_v31 = vld [vmem:[%s3916_s28 + $0x78] sm:$0xff] }
  0x1d   : > { %3680 = vmatpush3.msra.mxu1 %v3897_v2  ;;  %3632 = vmatprep.mubr.f32.mxu1 %v3930_v17  ;;  %v3997_v48 = vsub.f32 %v262_v32, %v3975_v40  ;;  %v362_v52 = vand.u32 4294901760, %v361_v41  ;;  %v372_v53 = vand.u32 4294901760, %v371_v42  ;;  %v382_v54 = vand.u32 4294901760, %v381_v43 }
  0x1e   : > { %3731 = vmatprep.subr.mxu1 %v3897_v2  ;;  %v401_v55 = vsub.f32 %v3967_v36, %v400_v44  ;;  %v411_v56 = vsub.f32 %v3971_v38, %v410_v46  ;;  %v420_v57 = vand.u32 4294901760, %v3994_v47  ;;  %v392_v61 = vand.u32 4294901760, %v391_v45 }
  0x1f   : > { %v430_v58 = vand.u32 4294901760, %v3997_v48  ;;  %3603 = vmatprep.mubr.f32.mxu0 %v362_v52  ;;  %v265_v62 = vsel %vm239_vm1, %v223_v49, 0  ;;  %v268_v63 = vsel %vm239_vm1, %v224_v50, 0  ;;  %v271_v0 = vsel %vm239_vm1, %v225_v51, 0 }
  0x20   : > { %3633 = vmatmul.mubr.f32.gmra.mxu1 %v3934_v20  ;;  %3604 = vmatmul.mubr.f32.vlgmr.msra.gmra.mxu0 %v372_v53  ;;  %v402_v1 = vand.u32 4294901760, %v401_v55  ;;  %v412_v5 = vand.u32 4294901760, %v411_v56  ;;  %v421_v6 = vsub.f32 %v3994_v47, %v420_v57  ;;  %v4020_v7 = vand.u32 4294901760, %v265_v62 }
  0x21   : > { %3635 = vmatprep.mubr.f32.mxu1 %v3950_v28  ;;  %3654 = vmatpush3.msra.mxu0 %v3903_v3  ;;  %v4024_v9 = vand.u32 4294901760, %v268_v63  ;;  %v4026_v10 = vand.u32 4294901760, %v271_v0  ;;  %v274_v11 = vsel %vm239_vm1, %v226_v59, 0  ;;  %v277_v12 = vsel %vm239_vm1, %v227_v60, 0 }
  0x22   : > { %3606 = vmatprep.mubr.f32.mxu0 %v382_v54  ;;  %v422_v14 = vand.u32 4294901760, %v421_v6  ;;  %v431_v18 = vsub.f32 %v3997_v48, %v430_v58  ;;  %v4036_v3 = vsub.f32 %v265_v62, %v4020_v7  ;;  %v4038_v19 = vand.u32 4294901760, %v274_v11  ;;  %3705 = vmatprep.subr.mxu0 %v3908_v4 }
  0x23   : > { %v4042_v21 = vsub.f32 %v268_v63, %v4024_v9  ;;  %v4045_v22 = vsub.f32 %v271_v0, %v4026_v10  ;;  %v4047_v23 = vand.u32 4294901760, %v277_v12  ;;  %v280_v24 = vsel %vm239_vm1, %v228_v8, 0 }
  0x24   : > { %3636 = vmatmul.mubr.f32.gmra.mxu1 %v3957_v30  ;;  %3607 = vmatmul.mubr.f32.gmra.mxu0 %v392_v61  ;;  %v440_v32 = vand.u32 4294901760, %v4036_v3  ;;  %v4054_v41 = vsub.f32 %v274_v11, %v4038_v19  ;;  %v4056_v42 = vand.u32 4294901760, %v280_v24  ;;  %v283_v43 = vsel %vm239_vm1, %v229_v13, 0 }
  0x25   : > { %3638 = vmatprep.mubr.f32.mxu1 %v3973_v39  ;;  %3609 = vmatprep.mubr.f32.mxu0 %v402_v1  ;;  %v450_v45 = vand.u32 4294901760, %v4042_v21  ;;  %v460_v49 = vand.u32 4294901760, %v4045_v22  ;;  %v4063_v50 = vsub.f32 %v277_v12, %v4047_v23  ;;  %v4065_v51 = vand.u32 4294901760, %v283_v43 }
  0x26   : > { %v441_v52 = vsub.f32 %v4036_v3, %v440_v32  ;;  %v286_v53 = vsel %vm239_vm1, %v230_v31, 0  ;;  %v432_v54 = vand.u32 4294901760, %v431_v18  ;;  %v470_v56 = vand.u32 4294901760, %v4054_v41 }
  0x27   : > { %v451_v55 = vsub.f32 %v4042_v21, %v450_v45  ;;  %v4077_v59 = vsub.f32 %v280_v24, %v4056_v42  ;;  %v4079_v60 = vand.u32 4294901760, %v286_v53  ;;  %v461_v62 = vsub.f32 %v4045_v22, %v460_v49 }
  0x28   : > { %3639 = vmatmul.mubr.f32.gmra.mxu1 %v3975_v40  ;;  %3610 = vmatmul.mubr.f32.gmra.mxu0 %v412_v5  ;;  %v442_v61 = vand.u32 4294901760, %v441_v52  ;;  %v480_v63 = vand.u32 4294901760, %v4063_v50  ;;  %v4087_v0 = vsub.f32 %v283_v43, %v4065_v51  ;;  %v471_v5 = vsub.f32 %v4054_v41, %v470_v56 }
  0x29   : > { %3641 = vmatprep.mubr.f32.mxu1 %v4020_v7  ;;  %3612 = vmatprep.mubr.f32.mxu0 %v422_v14  ;;  %v452_v1 = vand.u32 4294901760, %v451_v55  ;;  %v490_v6 = vand.u32 4294901760, %v4077_v59  ;;  %v509_v8 = vsub.f32 %v286_v53, %v4079_v60  ;;  %v462_v11 = vand.u32 4294901760, %v461_v62 }
  0x2a   : > { %v481_v12 = vsub.f32 %v4063_v50, %v480_v63  ;;  %v500_v13 = vand.u32 4294901760, %v4087_v0  ;;  %v472_v14 = vand.u32 4294901760, %v471_v5 }
  0x2b   : > { %v491_v18 = vsub.f32 %v4077_v59, %v490_v6  ;;  %v510_v24 = vand.u32 4294901760, %v509_v8 }
  0x2c   : > { %3642 = vmatmul.mubr.f32.gmra.mxu1 %v4024_v9  ;;  %3613 = vmatmul.mubr.f32.gmra.mxu0 %v432_v54  ;;  %v482_v31 = vand.u32 4294901760, %v481_v12  ;;  %v501_v43 = vsub.f32 %v4087_v0, %v500_v13 }
  0x2d   : > { %3644 = vmatprep.mubr.f32.mxu1 %v4026_v10  ;;  %3615 = vmatprep.mubr.f32.mxu0 %v442_v61  ;;  %v492_v52 = vand.u32 4294901760, %v491_v18  ;;  %v511_v53 = vsub.f32 %v509_v8, %v510_v24 }
  0x2e   : > { %v502_v54 = vand.u32 4294901760, %v501_v43 }
  0x2f   : > { %v512_v55 = vand.u32 4294901760, %v511_v53 }
  0x30   : > { %3645 = vmatmul.mubr.f32.gmra.mxu1 %v4038_v19  ;;  %3616 = vmatmul.mubr.f32.gmra.mxu0 %v452_v1 }
  0x31   : > { %3647 = vmatprep.mubr.f32.mxu1 %v4047_v23  ;;  %3618 = vmatprep.mubr.f32.mxu0 %v462_v11 }
  0x34   : > { %3648 = vmatmul.mubr.f32.gmra.mxu1 %v4056_v42  ;;  %3619 = vmatmul.mubr.f32.gmra.mxu0 %v472_v14 }
  0x35   : > { %3650 = vmatprep.mubr.f32.mxu1 %v4065_v51  ;;  %3621 = vmatprep.mubr.f32.mxu0 %v482_v31 }
  0x38   : > { %3651 = vmatmul.mubr.f32.gmra.mxu1 %v4079_v60  ;;  %3622 = vmatmul.mubr.f32.gmra.mxu0 %v492_v52 }
  0x39   : > { %3681 = vmatprep.mubr.f32.mxu1 %v360_v33  ;;  %3624 = vmatprep.mubr.f32.mxu0 %v502_v54 }
  0x3c   : > { %3682 = vmatmul.mubr.f32.vlgmr.msra.gmra.mxu1 %v370_v34  ;;  %3625 = vmatmul.mubr.f32.gmra.mxu0 %v512_v55 }
  0x3d   : > { %3732 = vmatpush3.msra.mxu1 %v3897_v2  ;;  %3684 = vmatprep.mubr.f32.mxu1 %v380_v35 }
  0x3e   : > { %3655 = vmatprep.mubr.f32.mxu0 %v3941_v25 }
  0x40   : > { %3685 = vmatmul.mubr.f32.gmra.mxu1 %v390_v37  ;;  %3656 = vmatmul.mubr.f32.vlgmr.msra.gmra.mxu0 %v3945_v26 }
  0x41   : > { %3687 = vmatprep.mubr.f32.mxu1 %v400_v44  ;;  %3706 = vmatpush3.msra.mxu0 %v3908_v4 }
  0x42   : > { %3658 = vmatprep.mubr.f32.mxu0 %v3948_v27  ;;  %v4183_v27 = vld [vmem:[%s4792_s2] ss:$0 sm:$0xff] }
  0x44   : > { %3688 = vmatmul.mubr.f32.gmra.mxu1 %v410_v46  ;;  %3659 = vmatmul.mubr.f32.gmra.mxu0 %v3955_v29 }
  0x45   : > { %3690 = vmatprep.mubr.f32.mxu1 %v420_v57  ;;  %3661 = vmatprep.mubr.f32.mxu0 %v3967_v36 }
  0x48   : > { %3691 = vmatmul.mubr.f32.gmra.mxu1 %v430_v58  ;;  %3662 = vmatmul.mubr.f32.gmra.mxu0 %v3971_v38 }
  0x49   : > { %3693 = vmatprep.mubr.f32.mxu1 %v440_v32  ;;  %3664 = vmatprep.mubr.f32.mxu0 %v3994_v47 }
  0x4c   : > { %3694 = vmatmul.mubr.f32.gmra.mxu1 %v450_v45  ;;  %3665 = vmatmul.mubr.f32.gmra.mxu0 %v3997_v48 }
  0x4d   : > { %3696 = vmatprep.mubr.f32.mxu1 %v460_v49  ;;  %3667 = vmatprep.mubr.f32.mxu0 %v4036_v3 }
  0x50   : > { %3697 = vmatmul.mubr.f32.gmra.mxu1 %v470_v56  ;;  %3668 = vmatmul.mubr.f32.gmra.mxu0 %v4042_v21 }
  0x51   : > { %3699 = vmatprep.mubr.f32.mxu1 %v480_v63  ;;  %3670 = vmatprep.mubr.f32.mxu0 %v4045_v22 }
  0x54   : > { %3700 = vmatmul.mubr.f32.gmra.mxu1 %v490_v6  ;;  %3671 = vmatmul.mubr.f32.gmra.mxu0 %v4054_v41 }
  0x55   : > { %3702 = vmatprep.mubr.f32.mxu1 %v500_v13  ;;  %3673 = vmatprep.mubr.f32.mxu0 %v4063_v50 }
  0x58   : > { %3703 = vmatmul.mubr.f32.gmra.mxu1 %v510_v24  ;;  %3674 = vmatmul.mubr.f32.gmra.mxu0 %v4077_v59 }
  0x59   : > { %3733 = vmatprep.mubr.f32.mxu1 %v3926_v15  ;;  %3676 = vmatprep.mubr.f32.mxu0 %v4087_v0 }
  0x5c   : > { %3734 = vmatmul.mubr.f32.vlgmr.msra.gmra.mxu1 %v3928_v16  ;;  %3677 = vmatmul.mubr.f32.gmra.mxu0 %v509_v8 }
  0x5d   : > { %3736 = vmatprep.mubr.f32.mxu1 %v3930_v17  ;;  %3707 = vmatprep.mubr.f32.mxu0 %v3926_v15 }
  0x60   : > { %3737 = vmatmul.mubr.f32.gmra.mxu1 %v3934_v20  ;;  %3708 = vmatmul.mubr.f32.vlgmr.msra.gmra.mxu0 %v3928_v16 }
  0x61   : > { %3739 = vmatprep.mubr.f32.mxu1 %v3950_v28  ;;  %3710 = vmatprep.mubr.f32.mxu0 %v3930_v17 }
  0x64   : > { %3740 = vmatmul.mubr.f32.gmra.mxu1 %v3957_v30  ;;  %3711 = vmatmul.mubr.f32.gmra.mxu0 %v3934_v20 }
  0x65   : > { %3742 = vmatprep.mubr.f32.mxu1 %v3973_v39  ;;  %3713 = vmatprep.mubr.f32.mxu0 %v3950_v28 }
  0x68   : > { %3743 = vmatmul.mubr.f32.gmra.mxu1 %v3975_v40  ;;  %3714 = vmatmul.mubr.f32.gmra.mxu0 %v3957_v30 }
  0x69   : > { %3745 = vmatprep.mubr.f32.mxu1 %v4020_v7  ;;  %3716 = vmatprep.mubr.f32.mxu0 %v3973_v39 }
  0x6c   : > { %3746 = vmatmul.mubr.f32.gmra.mxu1 %v4024_v9  ;;  %3717 = vmatmul.mubr.f32.gmra.mxu0 %v3975_v40 }
  0x6d   : > { %3748 = vmatprep.mubr.f32.mxu1 %v4026_v10  ;;  %3719 = vmatprep.mubr.f32.mxu0 %v4020_v7 }
  0x70   : > { %3749 = vmatmul.mubr.f32.gmra.mxu1 %v4038_v19  ;;  %3720 = vmatmul.mubr.f32.gmra.mxu0 %v4024_v9 }
  0x71   : > { %3751 = vmatprep.mubr.f32.mxu1 %v4047_v23  ;;  %3722 = vmatprep.mubr.f32.mxu0 %v4026_v10 }
  0x74   : > { %3752 = vmatmul.mubr.f32.gmra.mxu1 %v4056_v42  ;;  %3723 = vmatmul.mubr.f32.gmra.mxu0 %v4038_v19 }
  0x75   : > { %3754 = vmatprep.mubr.f32.mxu1 %v4065_v51  ;;  %3725 = vmatprep.mubr.f32.mxu0 %v4047_v23 }
  0x78   : > { %3755 = vmatmul.mubr.f32.gmra.mxu1 %v4079_v60  ;;  %3726 = vmatmul.mubr.f32.gmra.mxu0 %v4056_v42 }
  0x79   : > { %3728 = vmatprep.mubr.f32.mxu0 %v4065_v51 }
  0x7c   : > { %3729 = vmatmul.mubr.f32.gmra.mxu0 %v4079_v60 }
  0xdc   : > { %v4172_v2 = vpop.f32.mrf.mxu1 }
  0xde   : > { %v4174_v4 = vpop.f32.mrf.mxu1 }
  0xe0   : > { %v3634_v15 = vpop.f32.mrf.mxu1  ;;  %v4176_v17 = vpop.f32.mrf.mxu0 }
  0xe2   : > { %v602_v16 = vpop.f32.mrf.mxu1  ;;  %v4178_v25 = vpop.f32.mrf.mxu0 }
  0xe4   : > { %v3637_v20 = vpop.f32.mrf.mxu1  ;;  %v3608_v28 = vpop.f32.mrf.mxu0 }
  0xe5   : > { %v395_v30 = vadd.f32 %v3608_v28, %v4183_v27 }
  0xe6   : > { %v614_v26 = vpop.f32.mrf.mxu1  ;;  %v384_v33 = vpop.f32.mrf.mxu0 }
  0xe7   : > { %v4186_v35 = vadd.f32 %v3634_v15, %v395_v30  ;;  %v385_v36 = vadd.f32 %v4183_v27, %v384_v33 }
  0xe8   : > { %v3640_v29 = vpop.f32.mrf.mxu1  ;;  %v3611_v37 = vpop.f32.mrf.mxu0 }
  0xe9   : > { %v4189_v39 = vadd.f32 %v602_v16, %v385_v36  ;;  %v415_v40 = vadd.f32 %v3611_v37, %v4183_v27 }
  0xea   : > { %v626_v34 = vpop.f32.mrf.mxu1  ;;  %v404_v44 = vpop.f32.mrf.mxu0 }
  0xeb   : > { %v4192_v47 = vadd.f32 %v3637_v20, %v415_v40  ;;  %v405_v48 = vadd.f32 %v4183_v27, %v404_v44 }
  0xec   : > { %v3643_v38 = vpop.f32.mrf.mxu1  ;;  %v3614_v57 = vpop.f32.mrf.mxu0 }
  0xed   : > { %v4195_v7 = vadd.f32 %v614_v26, %v405_v48  ;;  %v435_v9 = vadd.f32 %v3614_v57, %v4183_v27 }
  0xee   : > { %v638_v46 = vpop.f32.mrf.mxu1  ;;  %v424_v10 = vpop.f32.mrf.mxu0 }
  0xef   : > { %v633_v19 = vadd.f32 %v3640_v29, %v435_v9  ;;  %v425_v21 = vadd.f32 %v4183_v27, %v424_v10 }
  0xf0   : > { %v3646_v58 = vpop.f32.mrf.mxu1  ;;  %v3617_v22 = vpop.f32.mrf.mxu0 }
  0xf1   : > { %v627_v32 = vadd.f32 %v626_v34, %v425_v21  ;;  %v455_v41 = vadd.f32 %v3617_v22, %v4183_v27 }
  0xf2   : > { %v650_v3 = vpop.f32.mrf.mxu1  ;;  %v444_v42 = vpop.f32.mrf.mxu0 }
  0xf3   : > { %v645_v49 = vadd.f32 %v3643_v38, %v455_v41  ;;  %v445_v50 = vadd.f32 %v4183_v27, %v444_v42 }
  0xf4   : > { %v3649_v23 = vpop.f32.mrf.mxu1  ;;  %v3620_v51 = vpop.f32.mrf.mxu0 }
  0xf5   : > { %v639_v59 = vadd.f32 %v638_v46, %v445_v50  ;;  %v475_v60 = vadd.f32 %v3620_v51, %v4183_v27 }
  0xf6   : > { %v662_v45 = vpop.f32.mrf.mxu1  ;;  %v464_v61 = vpop.f32.mrf.mxu0 }
  0xf7   : > { %v657_v63 = vadd.f32 %v3646_v58, %v475_v60  ;;  %v465_v0 = vadd.f32 %v4183_v27, %v464_v61 }
  0xf8   : > { %v3652_v56 = vpop.f32.mrf.mxu1  ;;  %v3623_v1 = vpop.f32.mrf.mxu0 }
  0xf9   : > { %v651_v6 = vadd.f32 %v650_v3, %v465_v0  ;;  %v495_v8 = vadd.f32 %v3623_v1, %v4183_v27  ;;  %v365_v0 = vadd.f32 %v4183_v27, %v4178_v25 }
  0xfa   : > { %v674_v62 = vpop.f32.mrf.mxu1  ;;  %v484_v11 = vpop.f32.mrf.mxu0 }
  0xfb   : > { %v669_v13 = vadd.f32 %v3649_v23, %v495_v8  ;;  %v485_v14 = vadd.f32 %v4183_v27, %v484_v11 }
  0xfc   : > { %v4203_v5 = vpop.f32.mrf.mxu1  ;;  %v3626_v18 = vpop.f32.mrf.mxu0 }
  0xfd   : > { %v663_v31 = vadd.f32 %v662_v45, %v485_v14  ;;  %v515_v43 = vadd.f32 %v3626_v18, %v4183_v27 }
  0xfe   : > { %v4206_v12 = vpop.f32.mrf.mxu1  ;;  %v504_v52 = vpop.f32.mrf.mxu0 }
  0xff   : > { %v681_v54 = vadd.f32 %v3652_v56, %v515_v43  ;;  %v505_v55 = vadd.f32 %v4183_v27, %v504_v52 }
 0x100   : > { %v4209_v24 = vpop.f32.mrf.mxu1  ;;  %v3657_v15 = vpop.f32.mrf.mxu0 }
 0x101   : > { %v675_v20 = vadd.f32 %v674_v62, %v505_v55 }
 0x102   : > { %v4212_v53 = vpop.f32.mrf.mxu1  ;;  %v754_v26 = vpop.f32.mrf.mxu0 }
 0x104   : > { %v4215_v16 = vpop.f32.mrf.mxu1  ;;  %v3660_v29 = vpop.f32.mrf.mxu0 }
 0x106   : > { %v4217_v28 = vpop.f32.mrf.mxu1  ;;  %v4219_v33 = vpop.f32.mrf.mxu0 }
 0x108   : > { %v3692_v30 = vpop.f32.mrf.mxu1  ;;  %v3663_v36 = vpop.f32.mrf.mxu0 }
 0x10a   : > { %v981_v34 = vpop.f32.mrf.mxu1  ;;  %v4221_v38 = vpop.f32.mrf.mxu0 }
 0x10c   : > { %v3695_v37 = vpop.f32.mrf.mxu1  ;;  %v3666_v44 = vpop.f32.mrf.mxu0 }
 0x10d   : > { %v804_v48 = vadd.f32 %v3666_v44, %v633_v19  ;;  %v375_v19 = vadd.f32 %v4176_v17, %v4183_v27  ;;  %v591_v17 = vadd.f32 %v4174_v4, %v365_v0  ;;  %v1451_v27 = vlaneseq }
 0x10e   : > { %v997_v40 = vpop.f32.mrf.mxu1  ;;  %v796_v57 = vpop.f32.mrf.mxu0  ;;  %v3840_v44 = vmov 1983009808   ;;  %v776_v4 = vadd.f32 %v3660_v29, %v4186_v35 }
 0x10f   : > { %v4223_v9 = vadd.f32 %v3692_v30, %v804_v48  ;;  %v797_v10 = vadd.f32 %v796_v57, %v627_v32  ;;  %v597_v11 = vadd.f32 %v4172_v2, %v375_v19 }
 0x110   : > { %v3698_v46 = vpop.f32.mrf.mxu1  ;;  %v3669_v3 = vpop.f32.mrf.mxu0  ;;  %v958_v29 = vadd.f32 %v4209_v24, %v776_v4 }
 0x111   : > { %v4225_v22 = vadd.f32 %v981_v34, %v797_v10  ;;  %v818_v23 = vadd.f32 %v3669_v3, %v645_v49  ;;  %v762_v52 = vadd.f32 %v3657_v15, %v597_v11  ;;  %v3839_v34 = vmov 1966171168  }
 0x112   : > { %v1013_v58 = vpop.f32.mrf.mxu1  ;;  %v810_v41 = vpop.f32.mrf.mxu0  ;;  %v1449_v25 = vunpack.c.l.s4 %v3839_v34  ;;  %v1452_v10 = vshrl.u32 %v1451_v27, 7 }
 0x113   : > { %v4227_v45 = vadd.f32 %v3695_v37, %v818_v23  ;;  %v811_v50 = vadd.f32 %v810_v41, %v639_v59  ;;  %v942_v48 = vadd.f32 %v4203_v5, %v762_v52  ;;  %v790_v23 = vadd.f32 %v3663_v36, %v4192_v47 }
 0x114   : > { %v3701_v21 = vpop.f32.mrf.mxu1  ;;  %v3672_v51 = vpop.f32.mrf.mxu0 }
 0x115   : > { %v4231_v60 = vadd.f32 %v997_v40, %v811_v50  ;;  %v832_v61 = vadd.f32 %v3672_v51, %v657_v63  ;;  %v974_v36 = vadd.f32 %v4215_v16, %v790_v23 }
 0x116   : > { %v1029_v42 = vpop.f32.mrf.mxu1  ;;  %v824_v62 = vpop.f32.mrf.mxu0 }
 0x117   : > { %v4235_v1 = vadd.f32 %v3698_v46, %v832_v61  ;;  %v825_v49 = vadd.f32 %v824_v62, %v651_v6  ;;  %v755_v6 = vadd.f32 %v754_v26, %v591_v17 }
 0x118   : > { %v3704_v56 = vpop.f32.mrf.mxu1  ;;  %v3675_v8 = vpop.f32.mrf.mxu0 }
 0x119   : > { %v4238_v59 = vadd.f32 %v1013_v58, %v825_v49  ;;  %v846_v14 = vadd.f32 %v3675_v8, %v669_v13  ;;  %v2746_v13 = vunpack.c.l.s4 %v3840_v44  ;;  %v1450_v58 = vunpack.c.0.s8 %v1449_v25 }
 0x11a   : > { %v1045_v32 = vpop.f32.mrf.mxu1  ;;  %v838_v18 = vpop.f32.mrf.mxu0  ;;  %v934_v26 = vadd.f32 %v4206_v12, %v755_v6  ;;  %v4275_v49 = vadd.f32 %v4221_v38, %v4195_v7 }
 0x11b   : > { %v4241_v63 = vadd.f32 %v3701_v21, %v846_v14  ;;  %v839_v55 = vadd.f32 %v838_v18, %v663_v31  ;;  %v769_v21 = vadd.f32 %v4219_v33, %v4189_v39  ;;  %v2747_v5 = vunpack.c.0.s8 %v2746_v13 }
 0x11c   : > { %v3735_v43 = vpop.f32.mrf.mxu1  ;;  %v3678_v30 = vpop.f32.mrf.mxu0  ;;  %v4261_v12 = vsub.s32 %v1450_v58, %v1452_v10 }
 0x11d   : > { %v4243_v37 = vadd.f32 %v1029_v42, %v839_v55  ;;  %v860_v2 = vadd.f32 %v3678_v30, %v681_v54  ;;  %v950_v47 = vadd.f32 %v4212_v53, %v769_v21  ;;  %v4267_v24 = vsub.s32 %v2747_v5, %v1452_v10 }
 0x11e   : > { %v852_v40 = vpop.f32.mrf.mxu0  ;;  %v1289_v46 = vpop.f32.mrf.mxu1 }
 0x11f   : > { %v4247_v15 = vadd.f32 %v3704_v56, %v860_v2  ;;  %v853_v31 = vadd.f32 %v852_v40, %v675_v20  ;;  %v4265_v56 = vsub.s32 0, %v1452_v10 }
 0x120   : > { %v3709_v57 = vpop.f32.mrf.mxu0  ;;  %v3738_v35 = vpop.f32.mrf.mxu1 }
 0x121   : > { %v4251_v3 = vadd.f32 %v1045_v32, %v853_v31  ;;  %v1134_v54 = vadd.f32 %v3709_v57, %v942_v48 }
 0x122   : > { %v1127_v41 = vpop.f32.mrf.mxu0  ;;  %v1301_v61 = vpop.f32.mrf.mxu1 }
 0x123   : > { %v1296_v20 = vadd.f32 %v3735_v43, %v1134_v54  ;;  %v1128_v42 = vadd.f32 %v1127_v41, %v934_v26 }
 0x124   : > { %v3712_v50 = vpop.f32.mrf.mxu0  ;;  %v3741_v34 = vpop.f32.mrf.mxu1 }
 0x125   : > { %vm1384_vm2 = vcmp.ge.f32.partialorder %v1296_v20, 0.0  ;;  %v1400_v51 = vmul.f32 0.1, %v1296_v20  ;;  %v1290_v39 = vadd.f32 %v1289_v46, %v1128_v42  ;;  %v1146_v33 = vadd.f32 %v3712_v50, %v958_v29 }
 0x126   : > { %v1139_v19 = vpop.f32.mrf.mxu0 }
 0x127   : > { %v1416_v62 = vsel %vm1384_vm2, %v1296_v20, %v1400_v51  ;;  %vm1383_vm3 = vcmp.ge.f32.partialorder %v1290_v39, 0.0  ;;  %v1399_v32 = vmul.f32 0.1, %v1290_v39  ;;  %v1308_v0 = vadd.f32 %v3738_v35, %v1146_v33 }
 0x128   : > { %v1496_v53 = vcombine.high %v1416_v62, %v1416_v62  ;;  %v1503_v16 = vrot.slane %v1416_v62, %v4261_v12  ;;  %v1140_v8 = vadd.f32 %v1139_v19, %v950_v47  ;;  %v3715_v11 = vpop.f32.mrf.mxu0 }
 0x129   : > { %v1415_v14 = vsel %vm1383_vm3, %v1290_v39, %v1399_v32  ;;  %vm1386_vm4 = vcmp.ge.f32.partialorder %v1308_v0, 0.0  ;;  %v1402_v18 = vmul.f32 0.1, %v1308_v0  ;;  %v1158_v43 = vadd.f32 %v3715_v11, %v974_v36 }
 0x12a   : > { %v1510_v17 = vrot.slane %v1496_v53, %v4261_v12  ;;  %v1511_v52 = vcombine.high %v1503_v16, %v1503_v16  ;;  %v1519_v55 = vrot.slane %v1503_v16, %v4261_v12  ;;  %v1447_v30 = vcombine.high %v1415_v14, %v1415_v14 }
 0x12b   : > { %v1454_v7 = vrot.slane %v1415_v14, %v4261_v12  ;;  %v4281_v38 = vsel %vm1386_vm4, %v1308_v0, %v1402_v18  ;;  %v4283_v25 = vadd.f32 %v1301_v61, %v1140_v8  ;;  %v4285_v27 = vadd.f32 %v3741_v34, %v1158_v43 }
 0x12c   : > { %v1512_v6 = vcombine.high %v1510_v17, %v1510_v17  ;;  %v1526_v2 = vrot.slane %v1510_v17, %v4261_v12  ;;  %v1533_v40 = vrot.slane %v1511_v52, %v4261_v12  ;;  %v1541_v44 = vcombine.high %v1519_v55, %v1519_v55 }
 0x12d   : > { %v2266_v13 = vrot.slane %v1519_v55, %v4265_v56  ;;  %v1461_v46 = vrot.slane %v1447_v30, %v4261_v12  ;;  %v1462_v48 = vcombine.high %v1454_v7, %v1454_v7  ;;  %v1470_v4 = vrot.slane %v1454_v7, %v4261_v12 }
 0x12e   : > { %v1540_v31 = vrot.slane %v1512_v6, %v4261_v12  ;;  %v1542_v57 = vcombine.high %v1526_v2, %v1526_v2  ;;  %v1543_v58 = vcombine.high %v1533_v40, %v1533_v40  ;;  %v2270_v10 = vrot.slane %v1533_v40, %v4265_v56 }
 0x12f   : > { %v2274_v26 = vrot.slane %v1541_v44, %v4265_v56  ;;  %v2282_v54 = vrot.slane %v1526_v2, %v4265_v56  ;;  %v1463_v21 = vcombine.high %v1461_v46, %v1461_v46  ;;  %v1477_v23 = vrot.slane %v1461_v46, %v4261_v12 }
 0x130   : > { %v1544_v5 = vcombine.high %v1540_v31, %v1540_v31  ;;  %v2278_v41 = vrot.slane %v1543_v58, %v4265_v56  ;;  %v2286_v35 = vrot.slane %v1540_v31, %v4265_v56  ;;  %v2290_v29 = vrot.slane %v1542_v57, %v4265_v56 }
 0x131   : > { %v2777_v20 = vcombine.low %v2266_v13, %v2270_v10  ;;  %v1484_v42 = vrot.slane %v1462_v48, %v4261_v12  ;;  %v1491_v50 = vrot.slane %v1463_v21, %v4261_v12  ;;  %v1492_v51 = vcombine.high %v1470_v4, %v1470_v4 }
 0x132   : > { %v2294_v39 = vrot.slane %v1544_v5, %v4265_v56  ;;  %v2778_v33 = vcombine.low %v2274_v26, %v2278_v41  ;;  %v2794_v47 = vcombine.low %v2282_v54, %v2286_v35  ;;  %v1493_v36 = vcombine.high %v1477_v23, %v1477_v23 }
 0x133   : > { %v2785_v19 = vrot.slane %v2777_v20, %v4267_v24  ;;  %v1494_v61 = vcombine.high %v1484_v42, %v1484_v42  ;;  %v1495_v62 = vcombine.high %v1491_v50, %v1491_v50  ;;  %v2234_v32 = vrot.slane %v1470_v4, %v4265_v56 }
 0x134   : > { %v2792_v0 = vrot.slane %v2778_v33, %v4267_v24  ;;  %v2795_v53 = vcombine.low %v2290_v29, %v2294_v39  ;;  %v2802_v16 = vrot.slane %v2794_v47, %v4267_v24  ;;  %v2238_v8 = vrot.slane %v1484_v42, %v4265_v56 }
 0x135   : > { %v2242_v11 = vrot.slane %v1492_v51, %v4265_v56  ;;  %v2246_v14 = vrot.slane %v1494_v61, %v4265_v56  ;;  %v2250_v18 = vrot.slane %v1477_v23, %v4265_v56  ;;  %v2254_v43 = vrot.slane %v1491_v50, %v4265_v56 }
 0x136   : > { %v2793_v17 = vcombine.low %v2785_v19, %v2792_v0  ;;  %v2809_v52 = vrot.slane %v2795_v53, %v4267_v24  ;;  %v2258_v55 = vrot.slane %v1493_v36, %v4265_v56  ;;  %v2262_v30 = vrot.slane %v1495_v62, %v4265_v56 }
 0x137   : > { %v2743_v34 = vcombine.low %v2234_v32, %v2238_v8  ;;  %v2744_v7 = vcombine.low %v2242_v11, %v2246_v14  ;;  %v2760_v6 = vcombine.low %v2250_v18, %v2254_v43  ;;  %v1594_v2 = vcombine.high %v4281_v38, %v4281_v38 }
 0x138   : > { %v2810_v40 = vcombine.low %v2802_v16, %v2809_v52  ;;  %3322 = vst.msk [vmem:[%s4313_s12 + $0x10] sm:$0xff] %vm3319_vm5, %v2793_v17  ;;  %3326 = vst.msk [vmem:[%s4313_s12 + $0x30] sm:$0xff] %vm3319_vm5, %v2793_v17  ;;  %v2761_v44 = vcombine.low %v2258_v55, %v2262_v30  ;;  %v1601_v13 = vrot.slane %v4281_v38, %v4261_v12  ;;  %vm1385_vm6 = vcmp.ge.f32.partialorder %v4283_v25, 0.0 }
 0x139   : > { %v2751_v46 = vrot.slane %v2743_v34, %v4267_v24  ;;  %v2758_v48 = vrot.slane %v2744_v7, %v4267_v24  ;;  %v2768_v4 = vrot.slane %v2760_v6, %v4267_v24  ;;  %v1608_v31 = vrot.slane %v1594_v2, %v4261_v12  ;;  %v1151_v7 = vpop.f32.mrf.mxu0 }
 0x13a   : > { %3323 = vst.msk [vmem:[%s4313_s12 + $0x18] sm:$0xff] %vm3319_vm5, %v2810_v40  ;;  %3327 = vst.msk [vmem:[%s4313_s12 + $0x38] sm:$0xff] %vm3319_vm5, %v2810_v40  ;;  %v2775_v57 = vrot.slane %v2761_v44, %v4267_v24  ;;  %v1609_v58 = vcombine.high %v1601_v13, %v1601_v13  ;;  %v1617_v38 = vrot.slane %v1601_v13, %v4261_v12  ;;  %v1401_v10 = vmul.f32 0.1, %v4283_v25 }
 0x13b   : > { %v4344_v26 = vadd.f32 %v4217_v28, %v4275_v49  ;;  %v2759_v54 = vcombine.low %v2751_v46, %v2758_v48  ;;  %v1610_v21 = vcombine.high %v1608_v31, %v1608_v31  ;;  %v1624_v23 = vrot.slane %v1608_v31, %v4261_v12 }
 0x13c   : > { %v2776_v5 = vcombine.low %v2768_v4, %v2775_v57  ;;  %v1631_v41 = vrot.slane %v1609_v58, %v4261_v12  ;;  %v1639_v35 = vcombine.high %v1617_v38, %v1617_v38  ;;  %v2330_v29 = vrot.slane %v1617_v38, %v4265_v56 }
 0x13d   : > { %3320 = vst.msk [vmem:[%s4313_s12] sm:$0xff] %vm3319_vm5, %v2759_v54  ;;  %3324 = vst.msk [vmem:[%s4313_s12 + $0x20] sm:$0xff] %vm3319_vm5, %v2759_v54  ;;  %v1638_v20 = vrot.slane %v1610_v21, %v4261_v12  ;;  %v1640_v42 = vcombine.high %v1624_v23, %v1624_v23  ;;  %v2346_v28 = vrot.slane %v1624_v23, %v4265_v56  ;;  %vm1388_vm7 = vcmp.ge.f32.partialorder %v4285_v27, 0.0 }
 0x13e   : > { %v1417_v49 = vsel %vm1385_vm6, %v4283_v25, %v1401_v10  ;;  %3321 = vst.msk [vmem:[%s4313_s12 + $0x8] sm:$0xff] %vm3319_vm5, %v2776_v5  ;;  %3325 = vst.msk [vmem:[%s4313_s12 + $0x28] sm:$0xff] %vm3319_vm5, %v2776_v5  ;;  %v1641_v50 = vcombine.high %v1631_v41, %v1631_v41  ;;  %v2334_v51 = vrot.slane %v1631_v41, %v4265_v56  ;;  %v1404_v0 = vmul.f32 0.1, %v4285_v27  ;;  %v1313_v5 = vpop.f32.mrf.mxu1  ;;  %v3718_v41 = vpop.f32.mrf.mxu0 }
 0x13f   : > { %v2338_v39 = vrot.slane %v1639_v35, %v4265_v56  ;;  %v1545_v33 = vcombine.high %v1417_v49, %v1417_v49  ;;  %v1642_v47 = vcombine.high %v1638_v20, %v1638_v20  ;;  %v2350_v36 = vrot.slane %v1638_v20, %v4265_v56 }
 0x140   : > { %v2354_v19 = vrot.slane %v1640_v42, %v4265_v56  ;;  %v1552_v61 = vrot.slane %v1417_v49, %v4261_v12  ;;  %v2342_v25 = vrot.slane %v1641_v50, %v4265_v56  ;;  %v2845_v62 = vcombine.low %v2330_v29, %v2334_v51 }
 0x141   : > { %v1559_v32 = vrot.slane %v1545_v33, %v4261_v12  ;;  %v2358_v53 = vrot.slane %v1642_v47, %v4265_v56  ;;  %v2862_v16 = vcombine.low %v2346_v28, %v2350_v36  ;;  %v1420_v20 = vsel %vm1388_vm7, %v4285_v27, %v1404_v0 }
 0x142   : > { %v1560_v8 = vcombine.high %v1552_v61, %v1552_v61  ;;  %v1568_v11 = vrot.slane %v1552_v61, %v4261_v12  ;;  %v2846_v14 = vcombine.low %v2338_v39, %v2342_v25  ;;  %v2853_v18 = vrot.slane %v2845_v62, %v4267_v24  ;;  %v3744_v25 = vpop.f32.mrf.mxu1 }
 0x143   : > { %v1561_v43 = vcombine.high %v1559_v32, %v1559_v32  ;;  %v1575_v17 = vrot.slane %v1559_v32, %v4261_v12  ;;  %v2863_v52 = vcombine.low %v2354_v19, %v2358_v53  ;;  %v2870_v55 = vrot.slane %v2862_v16, %v4267_v24 }
 0x144   : > { %v1582_v30 = vrot.slane %v1560_v8, %v4261_v12  ;;  %v1590_v34 = vcombine.high %v1568_v11, %v1568_v11  ;;  %v2860_v6 = vrot.slane %v2846_v14, %v4267_v24  ;;  %v2298_v44 = vrot.slane %v1568_v11, %v4265_v56 }
 0x145   : > { %v1589_v2 = vrot.slane %v1561_v43, %v4261_v12  ;;  %v1591_v40 = vcombine.high %v1575_v17, %v1575_v17  ;;  %v2877_v13 = vrot.slane %v2863_v52, %v4267_v24  ;;  %v2314_v58 = vrot.slane %v1575_v17, %v4265_v56 }
 0x146   : > { %v1592_v46 = vcombine.high %v1582_v30, %v1582_v30  ;;  %v2302_v48 = vrot.slane %v1582_v30, %v4265_v56  ;;  %v2306_v4 = vrot.slane %v1590_v34, %v4265_v56  ;;  %v2861_v31 = vcombine.low %v2853_v18, %v2860_v6 }
 0x147   : > { %v1593_v57 = vcombine.high %v1589_v2, %v1589_v2  ;;  %v2318_v38 = vrot.slane %v1589_v2, %v4265_v56  ;;  %v2878_v10 = vcombine.low %v2870_v55, %v2877_v13  ;;  %v2322_v21 = vrot.slane %v1591_v40, %v4265_v56  ;;  %v1163_v40 = vpop.f32.mrf.mxu0 }
 0x148   : > { %v2310_v54 = vrot.slane %v1592_v46, %v4265_v56  ;;  %v2811_v23 = vcombine.low %v2298_v44, %v2302_v48  ;;  %3330 = vst.msk [vmem:[%s4313_s12 + $0x50] sm:$0xff] %vm3319_vm5, %v2861_v31  ;;  %3334 = vst.msk [vmem:[%s4313_s12 + $0x70] sm:$0xff] %vm3319_vm5, %v2861_v31  ;;  %v1152_v42 = vadd.f32 %v1151_v7, %v4344_v26 }
 0x149   : > { %v2326_v35 = vrot.slane %v1593_v57, %v4265_v56  ;;  %v2828_v29 = vcombine.low %v2314_v58, %v2318_v38  ;;  %3331 = vst.msk [vmem:[%s4313_s12 + $0x58] sm:$0xff] %vm3319_vm5, %v2878_v10  ;;  %3335 = vst.msk [vmem:[%s4313_s12 + $0x78] sm:$0xff] %vm3319_vm5, %v2878_v10  ;;  %v1692_v50 = vcombine.high %v1420_v20, %v1420_v20 }
 0x14a   : > { %v2812_v28 = vcombine.low %v2306_v4, %v2310_v54  ;;  %v2819_v49 = vrot.slane %v2811_v23, %v4267_v24  ;;  %v1699_v51 = vrot.slane %v1420_v20, %v4261_v12  ;;  %v1314_v47 = vadd.f32 %v1313_v5, %v1152_v42 }
 0x14b   : > { %v2829_v39 = vcombine.low %v2322_v21, %v2326_v35  ;;  %v2836_v33 = vrot.slane %v2828_v29, %v4267_v24  ;;  %v1170_v36 = vadd.f32 %v3718_v41, %v4223_v9  ;;  %v1706_v26 = vrot.slane %v1692_v50, %v4261_v12  ;;  %v3721_v35 = vpop.f32.mrf.mxu0 }
 0x14c   : > { %v2826_v27 = vrot.slane %v2812_v28, %v4267_v24  ;;  %v1707_v19 = vcombine.high %v1699_v51, %v1699_v51  ;;  %v1715_v61 = vrot.slane %v1699_v51, %v4261_v12  ;;  %vm1387_vm8 = vcmp.ge.f32.partialorder %v1314_v47, 0.0 }
 0x14d   : > { %v2843_v62 = vrot.slane %v2829_v39, %v4267_v24  ;;  %v1403_v32 = vmul.f32 0.1, %v1314_v47  ;;  %v4408_v0 = vadd.f32 %v3744_v25, %v1170_v36  ;;  %v1708_v9 = vcombine.high %v1706_v26, %v1706_v26 }
 0x14e   : > { %v2827_v53 = vcombine.low %v2819_v49, %v2826_v27  ;;  %v1722_v16 = vrot.slane %v1706_v26, %v4261_v12  ;;  %v1729_v8 = vrot.slane %v1707_v19, %v4261_v12  ;;  %v1737_v14 = vcombine.high %v1715_v61, %v1715_v61  ;;  %v1325_v49 = vpop.f32.mrf.mxu1 }
 0x14f   : > { %v2844_v11 = vcombine.low %v2836_v33, %v2843_v62  ;;  %v2394_v18 = vrot.slane %v1715_v61, %v4265_v56  ;;  %v1419_v43 = vsel %vm1387_vm8, %v1314_v47, %v1403_v32  ;;  %v1736_v17 = vrot.slane %v1708_v9, %v4261_v12  ;;  %v1175_v32 = vpop.f32.mrf.mxu0 }
 0x150   : > { %3328 = vst.msk [vmem:[%s4313_s12 + $0x40] sm:$0xff] %vm3319_vm5, %v2827_v53  ;;  %3332 = vst.msk [vmem:[%s4313_s12 + $0x60] sm:$0xff] %vm3319_vm5, %v2827_v53  ;;  %v1738_v52 = vcombine.high %v1722_v16, %v1722_v16  ;;  %v1739_v55 = vcombine.high %v1729_v8, %v1729_v8  ;;  %v2398_v30 = vrot.slane %v1729_v8, %v4265_v56  ;;  %vm1390_vm9 = vcmp.ge.f32.partialorder %v4408_v0, 0.0 }
 0x151   : > { %3329 = vst.msk [vmem:[%s4313_s12 + $0x48] sm:$0xff] %vm3319_vm5, %v2844_v11  ;;  %3333 = vst.msk [vmem:[%s4313_s12 + $0x68] sm:$0xff] %vm3319_vm5, %v2844_v11  ;;  %v2402_v34 = vrot.slane %v1737_v14, %v4265_v56  ;;  %v2410_v7 = vrot.slane %v1722_v16, %v4265_v56  ;;  %v1643_v6 = vcombine.high %v1419_v43, %v1419_v43  ;;  %v1406_v8 = vmul.f32 0.1, %v4408_v0  ;;  %v3747_v11 = vpop.f32.mrf.mxu1 }
 0x152   : > { %v1650_v2 = vrot.slane %v1419_v43, %v4261_v12  ;;  %v1740_v44 = vcombine.high %v1736_v17, %v1736_v17  ;;  %v2406_v13 = vrot.slane %v1739_v55, %v4265_v56  ;;  %v2414_v46 = vrot.slane %v1736_v17, %v4265_v56 }
 0x153   : > { %v2418_v48 = vrot.slane %v1738_v52, %v4265_v56  ;;  %v2913_v4 = vcombine.low %v2394_v18, %v2398_v30  ;;  %v1657_v31 = vrot.slane %v1643_v6, %v4261_v12  ;;  %v1164_v17 = vadd.f32 %v1163_v40, %v4225_v22 }
 0x154   : > { %v1658_v57 = vcombine.high %v1650_v2, %v1650_v2  ;;  %v1666_v58 = vrot.slane %v1650_v2, %v4261_v12  ;;  %v2422_v38 = vrot.slane %v1740_v44, %v4265_v56  ;;  %v2914_v10 = vcombine.low %v2402_v34, %v2406_v13 }
 0x155   : > { %v2930_v54 = vcombine.low %v2410_v7, %v2414_v46  ;;  %v2921_v21 = vrot.slane %v2913_v4, %v4267_v24  ;;  %v1659_v23 = vcombine.high %v1657_v31, %v1657_v31  ;;  %v1673_v5 = vrot.slane %v1657_v31, %v4261_v12  ;;  %v3724_v46 = vpop.f32.mrf.mxu0 }
 0x156   : > { %v1680_v41 = vrot.slane %v1658_v57, %v4261_v12  ;;  %v2928_v29 = vrot.slane %v2914_v10, %v4267_v24  ;;  %v2931_v20 = vcombine.low %v2418_v48, %v2422_v38  ;;  %v1688_v28 = vcombine.high %v1666_v58, %v1666_v58 }
 0x157   : > { %v2938_v42 = vrot.slane %v2930_v54, %v4267_v24  ;;  %v1687_v50 = vrot.slane %v1659_v23, %v4261_v12  ;;  %v1689_v51 = vcombine.high %v1673_v5, %v1673_v5  ;;  %v2362_v33 = vrot.slane %v1666_v58, %v4265_v56 }
 0x158   : > { %v1690_v39 = vcombine.high %v1680_v41, %v1680_v41  ;;  %v2929_v47 = vcombine.low %v2921_v21, %v2928_v29  ;;  %v2945_v36 = vrot.slane %v2931_v20, %v4267_v24  ;;  %v2366_v27 = vrot.slane %v1680_v41, %v4265_v56 }
 0x159   : > { %v2370_v26 = vrot.slane %v1688_v28, %v4265_v56  ;;  %v1691_v19 = vcombine.high %v1687_v50, %v1687_v50  ;;  %v2378_v25 = vrot.slane %v1673_v5, %v4265_v56  ;;  %v2382_v62 = vrot.slane %v1687_v50, %v4265_v56 }
 0x15a   : > { %v2374_v61 = vrot.slane %v1690_v39, %v4265_v56  ;;  %v2946_v53 = vcombine.low %v2938_v42, %v2945_v36  ;;  %3338 = vst.msk [vmem:[%s4313_s12 + $0x90] sm:$0xff] %vm3319_vm5, %v2929_v47  ;;  %3342 = vst.msk [vmem:[%s4313_s12 + $0xb0] sm:$0xff] %vm3319_vm5, %v2929_v47  ;;  %v2386_v9 = vrot.slane %v1689_v51, %v4265_v56 }
 0x15b   : > { %v2879_v16 = vcombine.low %v2362_v33, %v2366_v27  ;;  %v2390_v14 = vrot.slane %v1691_v19, %v4265_v56  ;;  %v2896_v43 = vcombine.low %v2378_v25, %v2382_v62  ;;  %v1422_v52 = vsel %vm1390_vm9, %v4408_v0, %v1406_v8  ;;  %v1337_v0 = vpop.f32.mrf.mxu1 }
 0x15c   : > { %v2880_v18 = vcombine.low %v2370_v26, %v2374_v61  ;;  %3339 = vst.msk [vmem:[%s4313_s12 + $0x98] sm:$0xff] %vm3319_vm5, %v2946_v53  ;;  %3343 = vst.msk [vmem:[%s4313_s12 + $0xb8] sm:$0xff] %vm3319_vm5, %v2946_v53  ;;  %v1182_v55 = vadd.f32 %v3721_v35, %v4227_v45  ;;  %v1176_v30 = vadd.f32 %v1175_v32, %v4231_v60 }
 0x15d   : > { %v2887_v34 = vrot.slane %v2879_v16, %v4267_v24  ;;  %v2897_v6 = vcombine.low %v2386_v9, %v2390_v14  ;;  %v1790_v2 = vcombine.high %v1422_v52, %v1422_v52  ;;  %v2904_v22 = vrot.slane %v2896_v43, %v4267_v24 }
 0x15e   : > { %v2894_v7 = vrot.slane %v2880_v18, %v4267_v24  ;;  %v1797_v40 = vrot.slane %v1422_v52, %v4261_v12  ;;  %v1326_v44 = vadd.f32 %v1325_v49, %v1164_v17  ;;  %v4467_v13 = vadd.f32 %v3747_v11, %v1182_v55 }
 0x15f   : > { %v2911_v60 = vrot.slane %v2897_v6, %v4267_v24  ;;  %v1804_v48 = vrot.slane %v1790_v2, %v4261_v12  ;;  %v4471_v4 = vadd.f32 %v1337_v0, %v1176_v30  ;;  %v4480_v21 = vadd.f32 %v3724_v46, %v4235_v1 }
 0x160   : > { %v2895_v45 = vcombine.low %v2887_v34, %v2894_v7  ;;  %v1805_v31 = vcombine.high %v1797_v40, %v1797_v40  ;;  %v1813_v57 = vrot.slane %v1797_v40, %v4261_v12  ;;  %vm1389_vm10 = vcmp.ge.f32.partialorder %v1326_v44, 0.0 }
 0x161   : > { %v1405_v58 = vmul.f32 0.1, %v1326_v44  ;;  %v2912_v38 = vcombine.low %v2904_v22, %v2911_v60  ;;  %v1806_v10 = vcombine.high %v1804_v48, %v1804_v48  ;;  %v1820_v54 = vrot.slane %v1804_v48, %v4261_v12 }
 0x162   : > { %3336 = vst.msk [vmem:[%s4313_s12 + $0x80] sm:$0xff] %vm3319_vm5, %v2895_v45  ;;  %3340 = vst.msk [vmem:[%s4313_s12 + $0xa0] sm:$0xff] %vm3319_vm5, %v2895_v45  ;;  %v1827_v23 = vrot.slane %v1805_v31, %v4261_v12  ;;  %v1835_v5 = vcombine.high %v1813_v57, %v1813_v57  ;;  %v2458_v41 = vrot.slane %v1813_v57, %v4265_v56  ;;  %vm1392_vm11 = vcmp.ge.f32.partialorder %v4467_v13, 0.0 }
 0x163   : > { %v1421_v35 = vsel %vm1389_vm10, %v1326_v44, %v1405_v58  ;;  %3337 = vst.msk [vmem:[%s4313_s12 + $0x88] sm:$0xff] %vm3319_vm5, %v2912_v38  ;;  %3341 = vst.msk [vmem:[%s4313_s12 + $0xa8] sm:$0xff] %vm3319_vm5, %v2912_v38  ;;  %v1834_v29 = vrot.slane %v1806_v10, %v4261_v12  ;;  %v1836_v20 = vcombine.high %v1820_v54, %v1820_v54  ;;  %v1408_v31 = vmul.f32 0.1, %v4467_v13  ;;  %v3750_v10 = vpop.f32.mrf.mxu1 }
 0x164   : > { %v2474_v42 = vrot.slane %v1820_v54, %v4265_v56  ;;  %v1741_v28 = vcombine.high %v1421_v35, %v1421_v35  ;;  %v1837_v49 = vcombine.high %v1827_v23, %v1827_v23  ;;  %v2462_v1 = vrot.slane %v1827_v23, %v4265_v56 }
 0x165   : > { %v2466_v50 = vrot.slane %v1835_v5, %v4265_v56  ;;  %v1748_v51 = vrot.slane %v1421_v35, %v4261_v12  ;;  %v1838_v39 = vcombine.high %v1834_v29, %v1834_v29  ;;  %v2478_v33 = vrot.slane %v1834_v29, %v4265_v56 }
 0x166   : > { %v2482_v47 = vrot.slane %v1836_v20, %v4265_v56  ;;  %v1755_v36 = vrot.slane %v1741_v28, %v4261_v12  ;;  %v2470_v27 = vrot.slane %v1837_v49, %v4265_v56  ;;  %v2981_v26 = vcombine.low %v2458_v41, %v2462_v1 }
 0x167   : > { %v1756_v19 = vcombine.high %v1748_v51, %v1748_v51  ;;  %v1764_v61 = vrot.slane %v1748_v51, %v4261_v12  ;;  %v2486_v25 = vrot.slane %v1838_v39, %v4265_v56  ;;  %v2998_v62 = vcombine.low %v2474_v42, %v2478_v33 }
 0x168   : > { %v1757_v32 = vcombine.high %v1755_v36, %v1755_v36  ;;  %v1771_v53 = vrot.slane %v1755_v36, %v4261_v12  ;;  %v2982_v9 = vcombine.low %v2466_v50, %v2470_v27  ;;  %v2989_v16 = vrot.slane %v2981_v26, %v4267_v24 }
 0x169   : > { %v1778_v8 = vrot.slane %v1756_v19, %v4261_v12  ;;  %v1786_v11 = vcombine.high %v1764_v61, %v1764_v61  ;;  %v2999_v14 = vcombine.low %v2482_v47, %v2486_v25  ;;  %v3006_v18 = vrot.slane %v2998_v62, %v4267_v24 }
 0x16a   : > { %v1785_v43 = vrot.slane %v1757_v32, %v4261_v12  ;;  %v1787_v17 = vcombine.high %v1771_v53, %v1771_v53  ;;  %v2996_v52 = vrot.slane %v2982_v9, %v4267_v24  ;;  %v2426_v30 = vrot.slane %v1764_v61, %v4265_v56 }
 0x16b   : > { %v1788_v55 = vcombine.high %v1778_v8, %v1778_v8  ;;  %v2430_v34 = vrot.slane %v1778_v8, %v4265_v56  ;;  %v3013_v7 = vrot.slane %v2999_v14, %v4267_v24  ;;  %v2434_v2 = vrot.slane %v1786_v11, %v4265_v56 }
 0x16c   : > { %v1789_v6 = vcombine.high %v1785_v43, %v1785_v43  ;;  %v2442_v22 = vrot.slane %v1771_v53, %v4265_v56  ;;  %v2997_v40 = vcombine.low %v2989_v16, %v2996_v52  ;;  %v2446_v0 = vrot.slane %v1785_v43, %v4265_v56 }
 0x16d   : > { %v2438_v44 = vrot.slane %v1788_v55, %v4265_v56  ;;  %v2450_v46 = vrot.slane %v1787_v17, %v4265_v56  ;;  %v3014_v45 = vcombine.low %v3006_v18, %v3013_v7  ;;  %v2947_v48 = vcombine.low %v2426_v30, %v2430_v34 }
 0x16e   : > { %v2454_v60 = vrot.slane %v1789_v6, %v4265_v56  ;;  %3346 = vst.msk [vmem:[%s4313_s12 + $0xd0] sm:$0xff] %vm3319_vm5, %v2997_v40  ;;  %3350 = vst.msk [vmem:[%s4313_s12 + $0xf0] sm:$0xff] %vm3319_vm5, %v2997_v40  ;;  %v2964_v58 = vcombine.low %v2442_v22, %v2446_v0  ;;  %vm1391_vm12 = vcmp.ge.f32.partialorder %v4471_v4, 0.0  ;;  %v1407_v38 = vmul.f32 0.1, %v4471_v4 }
 0x16f   : > { %v2948_v57 = vcombine.low %v2434_v2, %v2438_v44  ;;  %3347 = vst.msk [vmem:[%s4313_s12 + $0xd8] sm:$0xff] %vm3319_vm5, %v3014_v45  ;;  %3351 = vst.msk [vmem:[%s4313_s12 + $0xf8] sm:$0xff] %vm3319_vm5, %v3014_v45  ;;  %v2955_v54 = vrot.slane %v2947_v48, %v4267_v24  ;;  %v1424_v5 = vsel %vm1392_vm11, %v4467_v13, %v1408_v31 }
 0x170   : > { %v2965_v23 = vcombine.low %v2450_v46, %v2454_v60  ;;  %v1356_v41 = vadd.f32 %v3750_v10, %v4480_v21  ;;  %v2972_v29 = vrot.slane %v2964_v58, %v4267_v24  ;;  %v1888_v20 = vcombine.high %v1424_v5, %v1424_v5  ;;  %v1187_v10 = vpop.f32.mrf.mxu0 }
 0x171   : > { %v2962_v35 = vrot.slane %v2948_v57, %v4267_v24  ;;  %v1895_v42 = vrot.slane %v1424_v5, %v4261_v12  ;;  %v1423_v49 = vsel %vm1391_vm12, %v4471_v4, %v1407_v38 }
 0x172   : > { %v2979_v28 = vrot.slane %v2965_v23, %v4267_v24  ;;  %vm1394_vm13 = vcmp.ge.f32.partialorder %v1356_v41, 0.0  ;;  %v1410_v1 = vmul.f32 0.1, %v1356_v41  ;;  %v1902_v21 = vrot.slane %v1888_v20, %v4261_v12 }
 0x173   : > { %v2963_v13 = vcombine.low %v2955_v54, %v2962_v35  ;;  %v1903_v50 = vcombine.high %v1895_v42, %v1895_v42  ;;  %v1911_v51 = vrot.slane %v1895_v42, %v4261_v12  ;;  %v1839_v33 = vcombine.high %v1423_v49, %v1423_v49 }
 0x174   : > { %v2980_v39 = vcombine.low %v2972_v29, %v2979_v28  ;;  %v1846_v47 = vrot.slane %v1423_v49, %v4261_v12  ;;  %v4539_v36 = vsel %vm1394_vm13, %v1356_v41, %v1410_v1  ;;  %v1904_v4 = vcombine.high %v1902_v21, %v1902_v21 }
 0x175   : > { %3344 = vst.msk [vmem:[%s4313_s12 + $0xc0] sm:$0xff] %vm3319_vm5, %v2963_v13  ;;  %3348 = vst.msk [vmem:[%s4313_s12 + $0xe0] sm:$0xff] %vm3319_vm5, %v2963_v13  ;;  %v1918_v27 = vrot.slane %v1902_v21, %v4261_v12  ;;  %v1925_v26 = vrot.slane %v1903_v50, %v4261_v12  ;;  %v1933_v19 = vcombine.high %v1911_v51, %v1911_v51 }
 0x176   : > { %3345 = vst.msk [vmem:[%s4313_s12 + $0xc8] sm:$0xff] %vm3319_vm5, %v2980_v39  ;;  %3349 = vst.msk [vmem:[%s4313_s12 + $0xe8] sm:$0xff] %vm3319_vm5, %v2980_v39  ;;  %v2522_v61 = vrot.slane %v1911_v51, %v4265_v56  ;;  %v1853_v25 = vrot.slane %v1839_v33, %v4261_v12  ;;  %v1854_v62 = vcombine.high %v1846_v47, %v1846_v47  ;;  %v3727_v33 = vpop.f32.mrf.mxu0 }
 0x177   : > { %v1862_v32 = vrot.slane %v1846_v47, %v4261_v12  ;;  %v1932_v53 = vrot.slane %v1904_v4, %v4261_v12  ;;  %v1934_v9 = vcombine.high %v1918_v27, %v1918_v27  ;;  %v1935_v16 = vcombine.high %v1925_v26, %v1925_v26 }
 0x178   : > { %v2526_v8 = vrot.slane %v1925_v26, %v4265_v56  ;;  %v2530_v11 = vrot.slane %v1933_v19, %v4265_v56  ;;  %v2538_v14 = vrot.slane %v1918_v27, %v4265_v56  ;;  %v1855_v18 = vcombine.high %v1853_v25, %v1853_v25  ;;  %v1349_v19 = vpop.f32.mrf.mxu1 }
 0x179   : > { %v1869_v43 = vrot.slane %v1853_v25, %v4261_v12  ;;  %v1936_v17 = vcombine.high %v1932_v53, %v1932_v53  ;;  %v2534_v52 = vrot.slane %v1935_v16, %v4265_v56  ;;  %v2542_v55 = vrot.slane %v1932_v53, %v4265_v56 }
 0x17a   : > { %v2546_v30 = vrot.slane %v1934_v9, %v4265_v56  ;;  %v3049_v34 = vcombine.low %v2522_v61, %v2526_v8  ;;  %v1876_v7 = vrot.slane %v1854_v62, %v4261_v12  ;;  %v1883_v6 = vrot.slane %v1855_v18, %v4261_v12 }
 0x17b   : > { %v1884_v2 = vcombine.high %v1862_v32, %v1862_v32  ;;  %v2550_v22 = vrot.slane %v1936_v17, %v4265_v56  ;;  %v3050_v40 = vcombine.low %v2530_v11, %v2534_v52  ;;  %v3066_v44 = vcombine.low %v2538_v14, %v2542_v55  ;;  %v1199_v52 = vpop.f32.mrf.mxu0 }
 0x17c   : > { %v1885_v0 = vcombine.high %v1869_v43, %v1869_v43  ;;  %v3057_v46 = vrot.slane %v3049_v34, %v4267_v24  ;;  %v1886_v45 = vcombine.high %v1876_v7, %v1876_v7  ;;  %v1887_v60 = vcombine.high %v1883_v6, %v1883_v6 }
 0x17d   : > { %v2490_v48 = vrot.slane %v1862_v32, %v4265_v56  ;;  %v3064_v31 = vrot.slane %v3050_v40, %v4267_v24  ;;  %v3067_v57 = vcombine.low %v2546_v30, %v2550_v22  ;;  %v3074_v58 = vrot.slane %v3066_v44, %v4267_v24 }
 0x17e   : > { %v2494_v38 = vrot.slane %v1876_v7, %v4265_v56  ;;  %v2498_v54 = vrot.slane %v1884_v2, %v4265_v56  ;;  %v2502_v23 = vrot.slane %v1886_v45, %v4265_v56  ;;  %v2506_v5 = vrot.slane %v1869_v43, %v4265_v56  ;;  %v3753_v7 = vpop.f32.mrf.mxu1 }
 0x17f   : > { %v2510_v41 = vrot.slane %v1883_v6, %v4265_v56  ;;  %v3065_v35 = vcombine.low %v3057_v46, %v3064_v31  ;;  %v3081_v29 = vrot.slane %v3067_v57, %v4267_v24  ;;  %v2514_v20 = vrot.slane %v1885_v0, %v4265_v56 }
 0x180   : > { %v2518_v42 = vrot.slane %v1887_v60, %v4265_v56  ;;  %v3015_v28 = vcombine.low %v2490_v48, %v2494_v38  ;;  %v3016_v49 = vcombine.low %v2498_v54, %v2502_v23  ;;  %v1986_v13 = vcombine.high %v4539_v36, %v4539_v36 }
 0x181   : > { %v3032_v1 = vcombine.low %v2506_v5, %v2510_v41  ;;  %v3082_v21 = vcombine.low %v3074_v58, %v3081_v29  ;;  %3354 = vst.msk [vmem:[%s4313_s12 + $0x110] sm:$0xff] %vm3319_vm5, %v3065_v35  ;;  %3358 = vst.msk [vmem:[%s4313_s12 + $0x130] sm:$0xff] %vm3319_vm5, %v3065_v35  ;;  %v1993_v51 = vrot.slane %v4539_v36, %v4261_v12  ;;  %v1361_v35 = vpop.f32.mrf.mxu1 }
 0x182   : > { %v3033_v50 = vcombine.low %v2514_v20, %v2518_v42  ;;  %v1188_v39 = vadd.f32 %v1187_v10, %v4238_v59  ;;  %v3023_v47 = vrot.slane %v3015_v28, %v4267_v24  ;;  %v3030_v4 = vrot.slane %v3016_v49, %v4267_v24 }
 0x183   : > { %v3040_v27 = vrot.slane %v3032_v1, %v4267_v24  ;;  %v2000_v26 = vrot.slane %v1986_v13, %v4261_v12  ;;  %3355 = vst.msk [vmem:[%s4313_s12 + $0x118] sm:$0xff] %vm3319_vm5, %v3082_v21  ;;  %3359 = vst.msk [vmem:[%s4313_s12 + $0x138] sm:$0xff] %vm3319_vm5, %v3082_v21  ;;  %v2001_v61 = vcombine.high %v1993_v51, %v1993_v51 }
 0x184   : > { %v3047_v36 = vrot.slane %v3033_v50, %v4267_v24  ;;  %v2009_v59 = vrot.slane %v1993_v51, %v4261_v12  ;;  %v1350_v25 = vadd.f32 %v1349_v19, %v1188_v39  ;;  %v3031_v62 = vcombine.low %v3023_v47, %v3030_v4 }
 0x185   : > { %v2002_v32 = vcombine.high %v2000_v26, %v2000_v26  ;;  %v2016_v53 = vrot.slane %v2000_v26, %v4261_v12  ;;  %v1206_v9 = vadd.f32 %v3727_v33, %v4241_v63  ;;  %v2023_v8 = vrot.slane %v2001_v61, %v4261_v12 }
 0x186   : > { %v3048_v16 = vcombine.low %v3040_v27, %v3047_v36  ;;  %v2031_v11 = vcombine.high %v2009_v59, %v2009_v59  ;;  %v2586_v14 = vrot.slane %v2009_v59, %v4265_v56  ;;  %3352 = vst.msk [vmem:[%s4313_s12 + $0x100] sm:$0xff] %vm3319_vm5, %v3031_v62  ;;  %3356 = vst.msk [vmem:[%s4313_s12 + $0x120] sm:$0xff] %vm3319_vm5, %v3031_v62  ;;  %vm1393_vm14 = vcmp.ge.f32.partialorder %v1350_v25, 0.0 }
 0x187   : > { %v2030_v18 = vrot.slane %v2002_v32, %v4261_v12  ;;  %v2032_v43 = vcombine.high %v2016_v53, %v2016_v53  ;;  %v2602_v17 = vrot.slane %v2016_v53, %v4265_v56  ;;  %v2033_v63 = vcombine.high %v2023_v8, %v2023_v8 }
 0x188   : > { %3353 = vst.msk [vmem:[%s4313_s12 + $0x108] sm:$0xff] %vm3319_vm5, %v3048_v16  ;;  %3357 = vst.msk [vmem:[%s4313_s12 + $0x128] sm:$0xff] %vm3319_vm5, %v3048_v16  ;;  %v2590_v55 = vrot.slane %v2023_v8, %v4265_v56  ;;  %v2594_v30 = vrot.slane %v2031_v11, %v4265_v56  ;;  %v1409_v34 = vmul.f32 0.1, %v1350_v25  ;;  %v1368_v40 = vadd.f32 %v3753_v7, %v1206_v9 }
 0x189   : > { %v2034_v6 = vcombine.high %v2030_v18, %v2030_v18  ;;  %v2606_v2 = vrot.slane %v2030_v18, %v4265_v56  ;;  %v2610_v22 = vrot.slane %v2032_v43, %v4265_v56  ;;  %v2598_v44 = vrot.slane %v2033_v63, %v4265_v56 }
 0x18a   : > { %v3117_v0 = vcombine.low %v2586_v14, %v2590_v55  ;;  %v1425_v46 = vsel %vm1393_vm14, %v1350_v25, %v1409_v34  ;;  %v1200_v45 = vadd.f32 %v1199_v52, %v4243_v37  ;;  %vm1396_vm15 = vcmp.ge.f32.partialorder %v1368_v40, 0.0  ;;  %v3730_v55 = vpop.f32.mrf.mxu0 }
 0x18b   : > { %v2614_v60 = vrot.slane %v2034_v6, %v4265_v56  ;;  %v3134_v48 = vcombine.low %v2602_v17, %v2606_v2  ;;  %v1937_v31 = vcombine.high %v1425_v46, %v1425_v46  ;;  %v1944_v57 = vrot.slane %v1425_v46, %v4261_v12 }
 0x18c   : > { %v3118_v58 = vcombine.low %v2594_v30, %v2598_v44  ;;  %v3125_v38 = vrot.slane %v3117_v0, %v4267_v24  ;;  %v1412_v10 = vmul.f32 0.1, %v1368_v40  ;;  %v4623_v42 = vadd.f32 %v1361_v35, %v1200_v45 }
 0x18d   : > { %v3135_v54 = vcombine.low %v2610_v22, %v2614_v60  ;;  %v3142_v23 = vrot.slane %v3134_v48, %v4267_v24  ;;  %v1951_v5 = vrot.slane %v1937_v31, %v4261_v12  ;;  %v1952_v41 = vcombine.high %v1944_v57, %v1944_v57 }
 0x18e   : > { %v3132_v37 = vrot.slane %v3118_v58, %v4267_v24  ;;  %v1960_v29 = vrot.slane %v1944_v57, %v4261_v12  ;;  %v1428_v20 = vsel %vm1396_vm15, %v1368_v40, %v1412_v10  ;;  %vm1395_vm0 = vcmp.ge.f32.partialorder %v4623_v42, 0.0 }
 0x18f   : > { %v3149_v28 = vrot.slane %v3135_v54, %v4267_v24  ;;  %v1953_v49 = vcombine.high %v1951_v5, %v1951_v5  ;;  %v1967_v1 = vrot.slane %v1951_v5, %v4261_v12  ;;  %v1974_v13 = vrot.slane %v1952_v41, %v4261_v12  ;;  %v3756_v41 = vpop.f32.mrf.mxu1 }
 0x190   : > { %v3133_v21 = vcombine.low %v3125_v38, %v3132_v37  ;;  %v1982_v50 = vcombine.high %v1960_v29, %v1960_v29  ;;  %v2554_v51 = vrot.slane %v1960_v29, %v4265_v56  ;;  %v2084_v39 = vcombine.high %v1428_v20, %v1428_v20  ;;  %v1211_v38 = vpop.f32.mrf.mxu0 }
 0x191   : > { %v3150_v33 = vcombine.low %v3142_v23, %v3149_v28  ;;  %v1981_v47 = vrot.slane %v1953_v49, %v4261_v12  ;;  %v1983_v4 = vcombine.high %v1967_v1, %v1967_v1  ;;  %v1984_v27 = vcombine.high %v1974_v13, %v1974_v13 }
 0x192   : > { %3362 = vst.msk [vmem:[%s4313_s12 + $0x150] sm:$0xff] %vm3319_vm5, %v3133_v21  ;;  %3366 = vst.msk [vmem:[%s4313_s12 + $0x170] sm:$0xff] %vm3319_vm5, %v3133_v21  ;;  %v2558_v26 = vrot.slane %v1974_v13, %v4265_v56  ;;  %v2562_v19 = vrot.slane %v1982_v50, %v4265_v56  ;;  %v2570_v36 = vrot.slane %v1967_v1, %v4265_v56  ;;  %v1411_v5 = vmul.f32 0.1, %v4623_v42 }
 0x193   : > { %v2091_v61 = vrot.slane %v1428_v20, %v4261_v12  ;;  %3363 = vst.msk [vmem:[%s4313_s12 + $0x158] sm:$0xff] %vm3319_vm5, %v3150_v33  ;;  %3367 = vst.msk [vmem:[%s4313_s12 + $0x178] sm:$0xff] %vm3319_vm5, %v3150_v33  ;;  %v1985_v59 = vcombine.high %v1981_v47, %v1981_v47  ;;  %v2566_v25 = vrot.slane %v1984_v27, %v4265_v56  ;;  %v1373_v33 = vpop.f32.mrf.mxu1 }
 0x194   : > { %v2574_v62 = vrot.slane %v1981_v47, %v4265_v56  ;;  %v2578_v32 = vrot.slane %v1983_v4, %v4265_v56  ;;  %v3083_v53 = vcombine.low %v2554_v51, %v2558_v26  ;;  %v2098_v9 = vrot.slane %v2084_v39, %v4261_v12 }
 0x195   : > { %v2099_v16 = vcombine.high %v2091_v61, %v2091_v61  ;;  %v2107_v8 = vrot.slane %v2091_v61, %v4261_v12  ;;  %v2582_v11 = vrot.slane %v1985_v59, %v4265_v56  ;;  %v3084_v14 = vcombine.low %v2562_v19, %v2566_v25 }
 0x196   : > { %v3100_v18 = vcombine.low %v2570_v36, %v2574_v62  ;;  %v3091_v43 = vrot.slane %v3083_v53, %v4267_v24  ;;  %v2100_v17 = vcombine.high %v2098_v9, %v2098_v9  ;;  %v2114_v52 = vrot.slane %v2098_v9, %v4261_v12 }
 0x197   : > { %v2121_v63 = vrot.slane %v2099_v16, %v4261_v12  ;;  %v3098_v30 = vrot.slane %v3084_v14, %v4267_v24  ;;  %v3101_v34 = vcombine.low %v2578_v32, %v2582_v11  ;;  %v2129_v6 = vcombine.high %v2107_v8, %v2107_v8 }
 0x198   : > { %v3108_v7 = vrot.slane %v3100_v18, %v4267_v24  ;;  %v2128_v2 = vrot.slane %v2100_v17, %v4261_v12  ;;  %v2130_v22 = vcombine.high %v2114_v52, %v2114_v52  ;;  %v2650_v44 = vrot.slane %v2107_v8, %v4265_v56 }
 0x199   : > { %v2131_v40 = vcombine.high %v2121_v63, %v2121_v63  ;;  %v3099_v0 = vcombine.low %v3091_v43, %v3098_v30  ;;  %v3115_v46 = vrot.slane %v3101_v34, %v4267_v24  ;;  %v2654_v45 = vrot.slane %v2121_v63, %v4265_v56 }
 0x19a   : > { %v2658_v60 = vrot.slane %v2129_v6, %v4265_v56  ;;  %v2132_v48 = vcombine.high %v2128_v2, %v2128_v2  ;;  %v2666_v57 = vrot.slane %v2114_v52, %v4265_v56  ;;  %v2670_v58 = vrot.slane %v2128_v2, %v4265_v56 }
 0x19b   : > { %v2662_v31 = vrot.slane %v2131_v40, %v4265_v56  ;;  %v3116_v10 = vcombine.low %v3108_v7, %v3115_v46  ;;  %3360 = vst.msk [vmem:[%s4313_s12 + $0x140] sm:$0xff] %vm3319_vm5, %v3099_v0  ;;  %3364 = vst.msk [vmem:[%s4313_s12 + $0x160] sm:$0xff] %vm3319_vm5, %v3099_v0  ;;  %v2674_v54 = vrot.slane %v2130_v22, %v4265_v56 }
 0x19c   : > { %v3185_v23 = vcombine.low %v2650_v44, %v2654_v45  ;;  %v2678_v35 = vrot.slane %v2132_v48, %v4265_v56  ;;  %v3202_v29 = vcombine.low %v2666_v57, %v2670_v58  ;;  %v1218_v20 = vadd.f32 %v3730_v55, %v4247_v15 }
 0x19d   : > { %v3186_v37 = vcombine.low %v2658_v60, %v2662_v31  ;;  %3361 = vst.msk [vmem:[%s4313_s12 + $0x148] sm:$0xff] %vm3319_vm5, %v3116_v10  ;;  %3365 = vst.msk [vmem:[%s4313_s12 + $0x168] sm:$0xff] %vm3319_vm5, %v3116_v10  ;;  %v1427_v28 = vsel %vm1395_vm0, %v4623_v42, %v1411_v5  ;;  %v1212_v49 = vadd.f32 %v1211_v38, %v4251_v3 }
 0x19e   : > { %v3193_v1 = vrot.slane %v3185_v23, %v4267_v24  ;;  %v3203_v21 = vcombine.low %v2674_v54, %v2678_v35  ;;  %v2035_v50 = vcombine.high %v1427_v28, %v1427_v28  ;;  %v3210_v15 = vrot.slane %v3202_v29, %v4267_v24 }
 0x19f   : > { %v3200_v13 = vrot.slane %v3186_v37, %v4267_v24  ;;  %v2042_v51 = vrot.slane %v1427_v28, %v4261_v12  ;;  %v1380_v39 = vadd.f32 %v3756_v41, %v1218_v20  ;;  %v4684_v42 = vadd.f32 %v1373_v33, %v1212_v49 }
 0x1a0   : > { %v3217_v4 = vrot.slane %v3203_v21, %v4267_v24  ;;  %v2049_v3 = vrot.slane %v2035_v50, %v4261_v12 }
 0x1a1   : > { %v3201_v47 = vcombine.low %v3193_v1, %v3200_v13  ;;  %v2050_v27 = vcombine.high %v2042_v51, %v2042_v51  ;;  %v2058_v26 = vrot.slane %v2042_v51, %v4261_v12  ;;  %vm1398_vm1 = vcmp.ge.f32.partialorder %v1380_v39, 0.0 }
 0x1a2   : > { %v1414_v19 = vmul.f32 0.1, %v1380_v39  ;;  %v3218_v36 = vcombine.low %v3210_v15, %v3217_v4  ;;  %v2051_v61 = vcombine.high %v2049_v3, %v2049_v3  ;;  %v2065_v59 = vrot.slane %v2049_v3, %v4261_v12 }
 0x1a3   : > { %3370 = vst.msk [vmem:[%s4313_s12 + $0x190] sm:$0xff] %vm3319_vm5, %v3201_v47  ;;  %3374 = vst.msk [vmem:[%s4313_s12 + $0x1b0] sm:$0xff] %vm3319_vm5, %v3201_v47  ;;  %v2072_v25 = vrot.slane %v2050_v27, %v4261_v12  ;;  %v2080_v62 = vcombine.high %v2058_v26, %v2058_v26  ;;  %v2618_v32 = vrot.slane %v2058_v26, %v4265_v56  ;;  %vm1397_vm2 = vcmp.ge.f32.partialorder %v4684_v42, 0.0 }
 0x1a4   : > { %v1430_v53 = vsel %vm1398_vm1, %v1380_v39, %v1414_v19  ;;  %3371 = vst.msk [vmem:[%s4313_s12 + $0x198] sm:$0xff] %vm3319_vm5, %v3218_v36  ;;  %3375 = vst.msk [vmem:[%s4313_s12 + $0x1b8] sm:$0xff] %vm3319_vm5, %v3218_v36  ;;  %v2079_v9 = vrot.slane %v2051_v61, %v4261_v12  ;;  %v2081_v16 = vcombine.high %v2065_v59, %v2065_v59  ;;  %v1413_v15 = vmul.f32 0.1, %v4684_v42 }
 0x1a5   : > { %v2634_v8 = vrot.slane %v2065_v59, %v4265_v56  ;;  %v2182_v11 = vcombine.high %v1430_v53, %v1430_v53  ;;  %v2082_v14 = vcombine.high %v2072_v25, %v2072_v25  ;;  %v2622_v18 = vrot.slane %v2072_v25, %v4265_v56 }
 0x1a6   : > { %v2626_v43 = vrot.slane %v2080_v62, %v4265_v56  ;;  %v2189_v17 = vrot.slane %v1430_v53, %v4261_v12  ;;  %v2083_v52 = vcombine.high %v2079_v9, %v2079_v9  ;;  %v2638_v63 = vrot.slane %v2079_v9, %v4265_v56 }
 0x1a7   : > { %v2642_v55 = vrot.slane %v2081_v16, %v4265_v56  ;;  %v2196_v30 = vrot.slane %v2182_v11, %v4261_v12  ;;  %v2630_v34 = vrot.slane %v2082_v14, %v4265_v56  ;;  %v3151_v7 = vcombine.low %v2618_v32, %v2622_v18 }
 0x1a8   : > { %v2197_v6 = vcombine.high %v2189_v17, %v2189_v17  ;;  %v2205_v2 = vrot.slane %v2189_v17, %v4261_v12  ;;  %v2646_v22 = vrot.slane %v2083_v52, %v4265_v56  ;;  %v3168_v40 = vcombine.low %v2634_v8, %v2638_v63 }
 0x1a9   : > { %v2198_v44 = vcombine.high %v2196_v30, %v2196_v30  ;;  %v2212_v0 = vrot.slane %v2196_v30, %v4261_v12  ;;  %v3152_v46 = vcombine.low %v2626_v43, %v2630_v34  ;;  %v3159_v45 = vrot.slane %v3151_v7, %v4267_v24 }
 0x1aa   : > { %v2219_v60 = vrot.slane %v2197_v6, %v4261_v12  ;;  %v2227_v48 = vcombine.high %v2205_v2, %v2205_v2  ;;  %v3169_v31 = vcombine.low %v2642_v55, %v2646_v22  ;;  %v3176_v57 = vrot.slane %v3168_v40, %v4267_v24 }
 0x1ab   : > { %v2226_v58 = vrot.slane %v2198_v44, %v4261_v12  ;;  %v2228_v38 = vcombine.high %v2212_v0, %v2212_v0  ;;  %v3166_v10 = vrot.slane %v3152_v46, %v4267_v24  ;;  %v2714_v23 = vrot.slane %v2205_v2, %v4265_v56 }
 0x1ac   : > { %v2229_v54 = vcombine.high %v2219_v60, %v2219_v60  ;;  %v2718_v5 = vrot.slane %v2219_v60, %v4265_v56  ;;  %v3183_v41 = vrot.slane %v3169_v31, %v4267_v24  ;;  %v2722_v37 = vrot.slane %v2227_v48, %v4265_v56 }
 0x1ad   : > { %v2230_v35 = vcombine.high %v2226_v58, %v2226_v58  ;;  %v2730_v29 = vrot.slane %v2212_v0, %v4265_v56  ;;  %v3167_v20 = vcombine.low %v3159_v45, %v3166_v10  ;;  %v2734_v49 = vrot.slane %v2226_v58, %v4265_v56 }
 0x1ae   : > { %v2726_v28 = vrot.slane %v2229_v54, %v4265_v56  ;;  %v2738_v1 = vrot.slane %v2228_v38, %v4265_v56  ;;  %v3184_v13 = vcombine.low %v3176_v57, %v3183_v41  ;;  %v3253_v50 = vcombine.low %v2714_v23, %v2718_v5 }
 0x1af   : > { %v2742_v21 = vrot.slane %v2230_v35, %v4265_v56  ;;  %3368 = vst.msk [vmem:[%s4313_s12 + $0x180] sm:$0xff] %vm3319_vm5, %v3167_v20  ;;  %3372 = vst.msk [vmem:[%s4313_s12 + $0x1a0] sm:$0xff] %vm3319_vm5, %v3167_v20  ;;  %v3270_v39 = vcombine.low %v2730_v29, %v2734_v49  ;;  %v1429_v47 = vsel %vm1397_vm2, %v4684_v42, %v1413_v15 }
 0x1b0   : > { %v3254_v51 = vcombine.low %v2722_v37, %v2726_v28  ;;  %3369 = vst.msk [vmem:[%s4313_s12 + $0x188] sm:$0xff] %vm3319_vm5, %v3184_v13  ;;  %3373 = vst.msk [vmem:[%s4313_s12 + $0x1a8] sm:$0xff] %vm3319_vm5, %v3184_v13  ;;  %v3261_v4 = vrot.slane %v3253_v50, %v4267_v24  ;;  %v2133_v27 = vcombine.high %v1429_v47, %v1429_v47 }
 0x1b1   : > { %v3271_v33 = vcombine.low %v2738_v1, %v2742_v21  ;;  %v2140_v26 = vrot.slane %v1429_v47, %v4261_v12  ;;  %v3278_v19 = vrot.slane %v3270_v39, %v4267_v24 }
 0x1b2   : > { %v3268_v3 = vrot.slane %v3254_v51, %v4267_v24  ;;  %v2147_v59 = vrot.slane %v2133_v27, %v4261_v12 }
 0x1b3   : > { %v3285_v36 = vrot.slane %v3271_v33, %v4267_v24  ;;  %v2148_v25 = vcombine.high %v2140_v26, %v2140_v26  ;;  %v2156_v62 = vrot.slane %v2140_v26, %v4261_v12 }
 0x1b4   : > { %v3269_v61 = vcombine.low %v3261_v4, %v3268_v3  ;;  %v2149_v32 = vcombine.high %v2147_v59, %v2147_v59  ;;  %v2163_v53 = vrot.slane %v2147_v59, %v4261_v12 }
 0x1b5   : > { %v3286_v42 = vcombine.low %v3278_v19, %v3285_v36  ;;  %v2170_v9 = vrot.slane %v2148_v25, %v4261_v12  ;;  %v2178_v16 = vcombine.high %v2156_v62, %v2156_v62  ;;  %v2682_v43 = vrot.slane %v2156_v62, %v4265_v56 }
 0x1b6   : > { %3378 = vst.msk [vmem:[%s4313_s12 + $0x1d0] sm:$0xff] %vm3319_vm5, %v3269_v61  ;;  %3382 = vst.msk [vmem:[%s4313_s12 + $0x1f0] sm:$0xff] %vm3319_vm5, %v3269_v61  ;;  %v2177_v8 = vrot.slane %v2149_v32, %v4261_v12  ;;  %v2179_v11 = vcombine.high %v2163_v53, %v2163_v53  ;;  %v2698_v55 = vrot.slane %v2163_v53, %v4265_v56 }
 0x1b7   : > { %3379 = vst.msk [vmem:[%s4313_s12 + $0x1d8] sm:$0xff] %vm3319_vm5, %v3286_v42  ;;  %3383 = vst.msk [vmem:[%s4313_s12 + $0x1f8] sm:$0xff] %vm3319_vm5, %v3286_v42  ;;  %v2180_v14 = vcombine.high %v2170_v9, %v2170_v9  ;;  %v2686_v18 = vrot.slane %v2170_v9, %v4265_v56  ;;  %v2690_v17 = vrot.slane %v2178_v16, %v4265_v56 }
 0x1b8   : > { %v2181_v52 = vcombine.high %v2177_v8, %v2177_v8  ;;  %v2702_v30 = vrot.slane %v2177_v8, %v4265_v56  ;;  %v2706_v34 = vrot.slane %v2179_v11, %v4265_v56 }
 0x1b9   : > { %v2694_v63 = vrot.slane %v2180_v14, %v4265_v56  ;;  %v3219_v12 = vcombine.low %v2682_v43, %v2686_v18 }
 0x1ba   : > { %v2710_v7 = vrot.slane %v2181_v52, %v4265_v56  ;;  %v3236_v2 = vcombine.low %v2698_v55, %v2702_v30 }
 0x1bb   : > { %v3220_v6 = vcombine.low %v2690_v17, %v2694_v63  ;;  %v3227_v22 = vrot.slane %v3219_v12, %v4267_v24 }
 0x1bc   : > { %v3237_v44 = vcombine.low %v2706_v34, %v2710_v7  ;;  %v3244_v46 = vrot.slane %v3236_v2, %v4267_v24 }
 0x1bd   : > { %v3234_v40 = vrot.slane %v3220_v6, %v4267_v24 }
 0x1be   : > { %v3251_v45 = vrot.slane %v3237_v44, %v4267_v24 }
 0x1bf   : > { %v3235_v0 = vcombine.low %v3227_v22, %v3234_v40 }
 0x1c0   : > { %v3252_v60 = vcombine.low %v3244_v46, %v3251_v45 }
 0x1c1   : > { %3376 = vst.msk [vmem:[%s4313_s12 + $0x1c0] sm:$0xff] %vm3319_vm5, %v3235_v0  ;;  %3380 = vst.msk [vmem:[%s4313_s12 + $0x1e0] sm:$0xff] %vm3319_vm5, %v3235_v0 }
 0x1c2   : > { %3377 = vst.msk [vmem:[%s4313_s12 + $0x1c8] sm:$0xff] %vm3319_vm5, %v3252_v60  ;;  %3381 = vst.msk [vmem:[%s4313_s12 + $0x1e8] sm:$0xff] %vm3319_vm5, %v3252_v60 }
 0x1c3 PF: > { %s13_s16 = sadd.s32 1, %s3837_s16   ;;  %s4795_s12 = smov %s3829_s14 }
 0x1c4   : > { %p10_p8 = scmp.ge.s32.totalorder %s13_s16, 6   ;;  %s4796_s13 = smov %s3833_s15 }
 0x1c5   : > { %s4797_s14 = smov %s4800_s17  ;;  %s4798_s15 = smov %s4804_s18 }
 0x1c6   :  { %12 = sbr.rel (!%p10_p8) target bundleno = 3 (0x3), region = 62 }

</bundles_post_ra>
